<compile_context>
chip_gen: v5e
topology: v5e:2x2
jax: 0.10.0
libtpu: 0.0.40
codegen_flags: <defaults>
</compile_context>

<pallas_src>
import functools

import jax
import jax.numpy as jnp
from jax.experimental import pallas as pl
from jax.experimental.pallas import tpu as pltpu

# Module-hardcoded dims (the PyTorch forward only works with these):
T = 65           # len_twe
J = 20           # len_que
HIDDEN = 50      # hidden_dim -> 2*hidden_dim = 100 (required by `.repeat(100,...)`)
D = 2 * HIDDEN   # feature dim of H and U (=100)


def attention_kernel(h_ref, u_ref, ws1_ref, ws2_ref, ws3_ref, g_ref):
    """Processes a (Bt, T, D) chunk of the batch per grid step.

    h_ref  : (Bt, T, D)      H chunk
    u_ref  : (Bt, J, D)      U chunk
    ws*_ref: (1, D)          single weight rows (module repeats them over seq)
    g_ref  : (Bt, T, 4*D)    output [H | Util | H*Util | H*Htil]
    """
    H = h_ref[...]                      # (Bt, T, D) f32
    U = u_ref[...]                      # (Bt, J, D) f32
    ws1 = ws1_ref[...][None, :, :]      # (1, 1, D)
    ws2 = ws2_ref[...][None, :, :]
    ws3 = ws3_ref[...][None, :, :]

    H1 = jnp.sum(H * ws1, axis=-1)[:, :, None]                # (Bt, T, 1)
    U1 = jnp.sum(U * ws2, axis=-1)[:, None, :]                # (Bt, 1, J)
    # ws3 is a per-feature vector on the contraction dim -> scale the small
    # operand (U, 20 rows) instead of H (65 rows); mathematically identical.
    HU = jnp.einsum('btd,bjd->btj', H, U * ws3,
                    preferred_element_type=jnp.float32)       # (Bt, T, J)
    S = HU + H1 + U1                                          # (Bt, T, J)

    # softmax over J (PyTorch softmax dim=2)
    s_max = jnp.max(S, axis=-1, keepdims=True)                # (Bt, T, 1)
    e = jnp.exp(S - s_max)
    at = e * pl.reciprocal(jnp.sum(e, axis=-1, keepdims=True), approx=False)

    Util = jnp.einsum('btj,bjd->btd', at, U,
                      preferred_element_type=jnp.float32)     # (Bt, T, D)

    # beta = max_j S == s_max (reused -> no second cross-lane max)
    # softmax over T (PyTorch softmax dim=1)
    b_max = jnp.max(s_max, axis=1, keepdims=True)             # (Bt, 1, 1)
    be = jnp.exp(s_max - b_max)                               # (Bt, T, 1)
    b = be * pl.reciprocal(jnp.sum(be, axis=1, keepdims=True), approx=False)
    h_sum = jnp.sum(b * H, axis=1, keepdims=True)             # (Bt, 1, D) = Htil row

    # Store each slab directly (no in-kernel concatenate / big VMEM temp).
    g_ref[:, :, 0:D] = H
    g_ref[:, :, D:2 * D] = Util
    g_ref[:, :, 2 * D:3 * D] = H * Util
    g_ref[:, :, 3 * D:4 * D] = H * h_sum                      # broadcast over T


@functools.partial(jax.jit, static_argnames=("block_b",))
def attention_forward(H, U, ws1, ws2, ws3, *, block_b=16):
    """Pallas forward of the BiDAF Attention module.

    H: (B, T, D), U: (B, J, D). ws* may be the module's row-repeated
    (T, D)/(J, D) tensors or single (1, D) rows; only the first row is used
    (all rows are identical by construction in the module).
    Returns G: (B, T, 4*D) float32.
    """
    B = H.shape[0]
    assert H.shape[1:] == (T, D) and U.shape[1:] == (J, D)

    # Batch chunking: amortize per-grid-step overhead with bigger DMAs while
    # keeping several grid steps for pipeline overlap / megacore sharding.
    Bt = max(1, min(block_b, B))
    n_blocks = -(-B // Bt)            # cdiv
    Bp = n_blocks * Bt

    H32 = H.astype(jnp.float32)
    U32 = U.astype(jnp.float32)
    if Bp != B:
        # Only batch padding (no lane padding) — all-zero rows are NaN-free
        # through the softmaxes and are sliced away below.
        H32 = jnp.pad(H32, ((0, Bp - B), (0, 0), (0, 0)))
        U32 = jnp.pad(U32, ((0, Bp - B), (0, 0), (0, 0)))

    ws1r = jnp.asarray(ws1, jnp.float32).reshape(-1, D)[:1]   # (1, D)
    ws2r = jnp.asarray(ws2, jnp.float32).reshape(-1, D)[:1]
    ws3r = jnp.asarray(ws3, jnp.float32).reshape(-1, D)[:1]

    G = pl.pallas_call(
        attention_kernel,
        out_shape=jax.ShapeDtypeStruct((Bp, T, 4 * D), jnp.float32),
        grid_spec=pltpu.PrefetchScalarGridSpec(
            num_scalar_prefetch=0,
            grid=(n_blocks,),
            in_specs=[
                pl.BlockSpec((Bt, T, D), lambda b: (b, 0, 0)),
                pl.BlockSpec((Bt, J, D), lambda b: (b, 0, 0)),
                pl.BlockSpec((1, D), lambda b: (0, 0)),
                pl.BlockSpec((1, D), lambda b: (0, 0)),
                pl.BlockSpec((1, D), lambda b: (0, 0)),
            ],
            out_specs=pl.BlockSpec((Bt, T, 4 * D), lambda b: (b, 0, 0)),
        ),
        compiler_params=pltpu.CompilerParams(
            dimension_semantics=("parallel",),
            vmem_limit_bytes=32 * 1024 * 1024,
        ),
    )(H32, U32, ws1r, ws2r, ws3r)

    if Bp != B:
        G = G[:B]
    return G


def reference_forward(H, U, ws1, ws2, ws3):
    # Pure-JAX reference mirroring the PyTorch forward exactly (tiled ws).
    H1 = jnp.sum(H * ws1, axis=2)[:, :, None]                 # (B,T,1) -> bcast J
    U1 = jnp.sum(U * ws2, axis=2)[:, None, :]                 # (B,1,J) -> bcast T
    HU = jnp.einsum('btd,bjd->btj', H * ws3, U)
    S = H1 + U1 + HU                                          # (B,T,J)
    at = jax.nn.softmax(S, axis=2)
    Util = jnp.einsum('btj,bjd->btd', at, U)
    beta = jnp.max(S, axis=2)                                 # (B,T)
    b = jax.nn.softmax(beta, axis=1)[:, :, None]              # (B,T,1)
    Htil = jnp.broadcast_to(jnp.sum(b * H, axis=1)[:, None, :], H.shape)
    return jnp.concatenate([H, Util, H * Util, H * Htil], axis=2)


if __name__ == "__main__":
    key = jax.random.PRNGKey(0)
    kH, kU, k1, k2, k3 = jax.random.split(key, 5)

    B = 8
    H = jax.random.normal(kH, (B, T, D), dtype=jnp.float32)
    U = jax.random.normal(kU, (B, J, D), dtype=jnp.float32)

    # generate_Ws*: a normal row of shape (1, 2*hidden) repeated over seq length.
    ws1_row = jax.random.normal(k1, (1, D), dtype=jnp.float32)
    ws2_row = jax.random.normal(k2, (1, D), dtype=jnp.float32)
    ws3_row = jax.random.normal(k3, (1, D), dtype=jnp.float32)
    ws1 = jnp.tile(ws1_row, (T, 1))
    ws2 = jnp.tile(ws2_row, (J, 1))
    ws3 = jnp.tile(ws3_row, (T, 1))

    # block_b=2 at B=8 gives 4 grid steps: pipeline overlap + even split
    # across the two v7x TensorCores.
    G = attention_forward(H, U, ws1, ws2, ws3, block_b=2)
    G = jax.block_until_ready(G)

    G_ref = reference_forward(H, U, ws1, ws2, ws3)
    assert G.shape == (B, T, 4 * D), G.shape
    assert jnp.allclose(G, G_ref, atol=1e-4, rtol=1e-4), "mismatch vs reference"

    print("KERNEL_OK")
</pallas_src>

<mosaic_0001>
module attributes {stable_mosaic.version = 11 : i64} {
  func.func @attention_kernel(%arg0: i32, %arg1: memref<2x65x100xf32, #tpu.memory_space<vmem>>, %arg2: memref<2x20x100xf32, #tpu.memory_space<vmem>>, %arg3: memref<1x100xf32, #tpu.memory_space<vmem>>, %arg4: memref<1x100xf32, #tpu.memory_space<vmem>>, %arg5: memref<1x100xf32, #tpu.memory_space<vmem>>, %arg6: memref<2x65x400xf32, #tpu.memory_space<vmem>>) attributes {dimension_semantics = [#tpu.dimension_semantics<parallel>], iteration_bounds = array<i64: 4>, scalar_prefetch = 0 : i64, scratch_operands = 0 : i64, tpu.core_type = #tpu.core_type<tc>, window_params = [{transform_indices = @transform_0, window_bounds = array<i64: 2, 65, 100>}, {transform_indices = @transform_1, window_bounds = array<i64: 2, 20, 100>}, {pipeline_mode = #tpu.pipeline_mode<synchronous>, transform_indices = @transform_2, window_bounds = array<i64: 1, 100>}, {pipeline_mode = #tpu.pipeline_mode<synchronous>, transform_indices = @transform_3, window_bounds = array<i64: 1, 100>}, {pipeline_mode = #tpu.pipeline_mode<synchronous>, transform_indices = @transform_4, window_bounds = array<i64: 1, 100>}, {transform_indices = @transform_5, window_bounds = array<i64: 2, 65, 400>}]} {
    %c0 = arith.constant 0 : index
    %c0_0 = arith.constant 0 : index
    %c0_1 = arith.constant 0 : index
    %0 = vector.load %arg1[%c0, %c0_0, %c0_1] : memref<2x65x100xf32, #tpu.memory_space<vmem>>, vector<2x65x100xf32>
    %c0_2 = arith.constant 0 : index
    %c0_3 = arith.constant 0 : index
    %c0_4 = arith.constant 0 : index
    %1 = vector.load %arg2[%c0_2, %c0_3, %c0_4] : memref<2x20x100xf32, #tpu.memory_space<vmem>>, vector<2x20x100xf32>
    %c0_5 = arith.constant 0 : index
    %c0_6 = arith.constant 0 : index
    %2 = vector.load %arg3[%c0_5, %c0_6] : memref<1x100xf32, #tpu.memory_space<vmem>>, vector<1x100xf32>
    %3 = vector.shape_cast %2 : vector<1x100xf32> to vector<1x1x100xf32>
    %c0_7 = arith.constant 0 : index
    %c0_8 = arith.constant 0 : index
    %4 = vector.load %arg4[%c0_7, %c0_8] : memref<1x100xf32, #tpu.memory_space<vmem>>, vector<1x100xf32>
    %5 = vector.shape_cast %4 : vector<1x100xf32> to vector<1x1x100xf32>
    %c0_9 = arith.constant 0 : index
    %c0_10 = arith.constant 0 : index
    %6 = vector.load %arg5[%c0_9, %c0_10] : memref<1x100xf32, #tpu.memory_space<vmem>>, vector<1x100xf32>
    %7 = vector.shape_cast %6 : vector<1x100xf32> to vector<1x1x100xf32>
    %8 = vector.broadcast %3 : vector<1x1x100xf32> to vector<2x65x100xf32>
    %9 = arith.mulf %0, %8 : vector<2x65x100xf32>
    %cst = arith.constant dense<0.000000e+00> : vector<2x65xf32>
    %10 = vector.multi_reduction <add>, %9, %cst [2] : vector<2x65x100xf32> to vector<2x65xf32>
    %11 = vector.shape_cast %10 : vector<2x65xf32> to vector<2x65x1xf32>
    %12 = vector.broadcast %5 : vector<1x1x100xf32> to vector<2x20x100xf32>
    %13 = arith.mulf %1, %12 : vector<2x20x100xf32>
    %cst_11 = arith.constant dense<0.000000e+00> : vector<2x20xf32>
    %14 = vector.multi_reduction <add>, %13, %cst_11 [2] : vector<2x20x100xf32> to vector<2x20xf32>
    %15 = vector.shape_cast %14 : vector<2x20xf32> to vector<2x1x20xf32>
    %16 = vector.broadcast %7 : vector<1x1x100xf32> to vector<2x20x100xf32>
    %17 = arith.mulf %1, %16 : vector<2x20x100xf32>
    "tpu.trace_start"() <{level = 10 : i32, message = "btd,bjd->btj"}> : () -> ()
    %cst_12 = arith.constant dense<0.000000e+00> : vector<2x65x20xf32>
    %18 = tpu.matmul %0, %17, %cst_12 {dimension_numbers = #tpu.dot_dimension_numbers<[2], [2], [1], [1], [0, 0, 0, 1, 1, 1], [0], [0]>} : vector<2x65x100xf32>, vector<2x20x100xf32>, vector<2x65x20xf32> -> vector<2x65x20xf32>
    "tpu.trace_stop"() : () -> ()
    %19 = vector.broadcast %11 : vector<2x65x1xf32> to vector<2x65x20xf32>
    %20 = arith.addf %18, %19 : vector<2x65x20xf32>
    %21 = vector.broadcast %15 : vector<2x1x20xf32> to vector<2x65x20xf32>
    %22 = arith.addf %20, %21 : vector<2x65x20xf32>
    %cst_13 = arith.constant dense<0xFF800000> : vector<2x65xf32>
    %23 = vector.multi_reduction <maximumf>, %22, %cst_13 [2] : vector<2x65x20xf32> to vector<2x65xf32>
    %24 = vector.shape_cast %23 : vector<2x65xf32> to vector<2x65x1xf32>
    %25 = vector.broadcast %24 : vector<2x65x1xf32> to vector<2x65x20xf32>
    %26 = arith.subf %22, %25 : vector<2x65x20xf32>
    %27 = math.exp %26 : vector<2x65x20xf32>
    %cst_14 = arith.constant dense<0.000000e+00> : vector<2x65xf32>
    %28 = vector.multi_reduction <add>, %27, %cst_14 [2] : vector<2x65x20xf32> to vector<2x65xf32>
    %29 = vector.shape_cast %28 : vector<2x65xf32> to vector<2x65x1xf32>
    %30 = tpu.reciprocal %29 : vector<2x65x1xf32> -> vector<2x65x1xf32>
    %31 = vector.broadcast %30 : vector<2x65x1xf32> to vector<2x65x20xf32>
    %32 = arith.mulf %27, %31 : vector<2x65x20xf32>
    "tpu.trace_start"() <{level = 10 : i32, message = "btj,bjd->btd"}> : () -> ()
    %cst_15 = arith.constant dense<0.000000e+00> : vector<2x65x100xf32>
    %33 = tpu.matmul %32, %1, %cst_15 {dimension_numbers = #tpu.dot_dimension_numbers<[2], [1], [1], [2], [0, 0, 0, 1, 1, 2], [0], [0]>} : vector<2x65x20xf32>, vector<2x20x100xf32>, vector<2x65x100xf32> -> vector<2x65x100xf32>
    "tpu.trace_stop"() : () -> ()
    %cst_16 = arith.constant dense<0xFF800000> : vector<2x1xf32>
    %34 = vector.multi_reduction <maximumf>, %24, %cst_16 [1] : vector<2x65x1xf32> to vector<2x1xf32>
    %35 = vector.shape_cast %34 : vector<2x1xf32> to vector<2x1x1xf32>
    %36 = vector.broadcast %35 : vector<2x1x1xf32> to vector<2x65x1xf32>
    %37 = arith.subf %24, %36 : vector<2x65x1xf32>
    %38 = math.exp %37 : vector<2x65x1xf32>
    %cst_17 = arith.constant dense<0.000000e+00> : vector<2x1xf32>
    %39 = vector.multi_reduction <add>, %38, %cst_17 [1] : vector<2x65x1xf32> to vector<2x1xf32>
    %40 = vector.shape_cast %39 : vector<2x1xf32> to vector<2x1x1xf32>
    %41 = tpu.reciprocal %40 : vector<2x1x1xf32> -> vector<2x1x1xf32>
    %42 = vector.broadcast %41 : vector<2x1x1xf32> to vector<2x65x1xf32>
    %43 = arith.mulf %38, %42 : vector<2x65x1xf32>
    %44 = vector.broadcast %43 : vector<2x65x1xf32> to vector<2x65x100xf32>
    %45 = arith.mulf %44, %0 : vector<2x65x100xf32>
    %cst_18 = arith.constant dense<0.000000e+00> : vector<2x100xf32>
    %46 = vector.multi_reduction <add>, %45, %cst_18 [1] : vector<2x65x100xf32> to vector<2x100xf32>
    %47 = vector.shape_cast %46 : vector<2x100xf32> to vector<2x1x100xf32>
    %c0_19 = arith.constant 0 : index
    %c0_20 = arith.constant 0 : index
    %c0_21 = arith.constant 0 : index
    %48 = vector.load %arg6[%c0_19, %c0_20, %c0_21] : memref<2x65x400xf32, #tpu.memory_space<vmem>>, vector<2x65x100xf32>
    tpu.vector_store %arg6[%c0_19, %c0_20, %c0_21], %0 {strides = array<i32>} : memref<2x65x400xf32, #tpu.memory_space<vmem>>, vector<2x65x100xf32>,
    %c0_22 = arith.constant 0 : index
    %c0_23 = arith.constant 0 : index
    %c100 = arith.constant 100 : index
    %49 = vector.load %arg6[%c0_22, %c0_23, %c100] : memref<2x65x400xf32, #tpu.memory_space<vmem>>, vector<2x65x100xf32>
    tpu.vector_store %arg6[%c0_22, %c0_23, %c100], %33 {strides = array<i32>} : memref<2x65x400xf32, #tpu.memory_space<vmem>>, vector<2x65x100xf32>,
    %50 = arith.mulf %0, %33 : vector<2x65x100xf32>
    %c0_24 = arith.constant 0 : index
    %c0_25 = arith.constant 0 : index
    %c200 = arith.constant 200 : index
    %51 = vector.load %arg6[%c0_24, %c0_25, %c200] : memref<2x65x400xf32, #tpu.memory_space<vmem>>, vector<2x65x100xf32>
    tpu.vector_store %arg6[%c0_24, %c0_25, %c200], %50 {strides = array<i32>} : memref<2x65x400xf32, #tpu.memory_space<vmem>>, vector<2x65x100xf32>,
    %52 = vector.broadcast %47 : vector<2x1x100xf32> to vector<2x65x100xf32>
    %53 = arith.mulf %0, %52 : vector<2x65x100xf32>
    %c0_26 = arith.constant 0 : index
    %c0_27 = arith.constant 0 : index
    %c300 = arith.constant 300 : index
    %54 = vector.load %arg6[%c0_26, %c0_27, %c300] : memref<2x65x400xf32, #tpu.memory_space<vmem>>, vector<2x65x100xf32>
    tpu.vector_store %arg6[%c0_26, %c0_27, %c300], %53 {strides = array<i32>} : memref<2x65x400xf32, #tpu.memory_space<vmem>>, vector<2x65x100xf32>,
    return
  }
  func.func @transform_0(%arg0: i32) -> (i32, i32, i32) {
    %c0_i32 = arith.constant 0 : i32
    %c0_i32_0 = arith.constant 0 : i32
    %c0_i32_1 = arith.constant 0 : i32
    return %arg0, %c0_i32, %c0_i32_0 : i32, i32, i32
  }
  func.func @transform_1(%arg0: i32) -> (i32, i32, i32) {
    %c0_i32 = arith.constant 0 : i32
    %c0_i32_0 = arith.constant 0 : i32
    %c0_i32_1 = arith.constant 0 : i32
    return %arg0, %c0_i32, %c0_i32_0 : i32, i32, i32
  }
  func.func @transform_2(%arg0: i32) -> (i32, i32) {
    %c0_i32 = arith.constant 0 : i32
    %c0_i32_0 = arith.constant 0 : i32
    %c0_i32_1 = arith.constant 0 : i32
    return %c0_i32, %c0_i32_0 : i32, i32
  }
  func.func @transform_3(%arg0: i32) -> (i32, i32) {
    %c0_i32 = arith.constant 0 : i32
    %c0_i32_0 = arith.constant 0 : i32
    %c0_i32_1 = arith.constant 0 : i32
    return %c0_i32, %c0_i32_0 : i32, i32
  }
  func.func @transform_4(%arg0: i32) -> (i32, i32) {
    %c0_i32 = arith.constant 0 : i32
    %c0_i32_0 = arith.constant 0 : i32
    %c0_i32_1 = arith.constant 0 : i32
    return %c0_i32, %c0_i32_0 : i32, i32
  }
  func.func @transform_5(%arg0: i32) -> (i32, i32, i32) {
    %c0_i32 = arith.constant 0 : i32
    %c0_i32_0 = arith.constant 0 : i32
    %c0_i32_1 = arith.constant 0 : i32
    return %arg0, %c0_i32, %c0_i32_0 : i32, i32, i32
  }
}

</mosaic_0001>

<bundles_post_ra>
// kernel: attention_forward.1
= control target key start
LH: loop header
LB: loop body
LE: loop exit
PB: predicated region body
PF: predicated region fallthrough
CT: control target
= control target key end

     0   :  { %s2116_s18 = smov 0   ;;  %s3506_s0 = inlined_call_operand.vmem [shape: f32[8,65,100], index: 0, kind: input, shape index: {}]   ;;  %s3507_s1 = inlined_call_operand.vmem [shape: f32[8,20,100], index: 1, kind: input, shape index: {}]   ;;  %s3508_s2 = inlined_call_operand.vmem [shape: f32[1,100], index: 2, kind: input, shape index: {}]   ;;  %s3509_s3 = inlined_call_operand.vmem [shape: f32[1,100], index: 3, kind: input, shape index: {}]   ;;  %s3510_s4 = inlined_call_operand.vmem [shape: f32[1,100], index: 4, kind: input, shape index: {}]   ;;  %s3511_s5 = inlined_call_operand.vmem [shape: f32[8,65,400], index: 5, kind: output, shape index: {}]  }
   0x1 LB: > { %s1889_s19 = sadd.s32 4294967295, %s2081_s18   ;;  %p1893_p0 = scmp.ge.s32.totalorder %s2081_s18, 1  ;;  %s2081_s18 = sphi %s2116_s18, %s15_s18  }
   0x2   : > { %p201_p1 = scmp.lt.s32.totalorder %s2081_s18, 5 }
   0x4   : > { %p202_p2 = pnand %p1893_p0, %p201_p1 }
   0x6   : > { %205 = sbr.rel (%p202_p2) target bundleno = 855 (0x357), region = 40 }
   0xb   : > { %s1894_s20 = sshll.u32 %s1889_s19, 1  ;;  %v1960_v0 = vld [vmem:[%s3510_s4] ss:$0 sm:$0xff]  ;;  %vm306_vm0 = vcmask 818176   ;;  %vm377_vm1 = vcmask 814080   ;;  %vm331_vm2 = vcmask 811008  }
   0xc   : > { %p238_p3 = scmp.lt.s32.totalorder %s1894_s20, 7  ;;  %v1961_v1 = vld [vmem:[%s3509_s3] ss:$0 sm:$0xff]  ;;  %vm570_vm3 = vcmask 130112   ;;  %vm574_vm4 = vcmask 195712   ;;  %vm621_vm5 = vcmask 162816  }
   0xd   : > { %v2193_v21 = vld [vmem:[%s3508_s2] ss:$0 sm:$0xff]  ;;  %vm646_vm6 = vcmask 155648   ;;  %vm1082_vm7 = vcmask 1043456   ;;  %vm1210_vm8 = vcmask 1040384   ;;  %s2083_s14 = smov 44  }
   0xe   : > { %s3609_s20 = smov (!%p238_p3, %s1894_s20), 7  ;;  %s2084_s15 = smov 100  }
   0xf   : > { %s1946_s21 = smul.u32 72, %s3609_s20  ;;  %s2085_s16 = smov 72  }
  0x10   : > { %s1947_s22 = smul.u32 24, %s3609_s20 }
  0x11   : > { %s2133_s29 = scalar_lea.vmem %s3506_s0, %s1946_s21  ;;  %s1948_s30 = smul.u32 288, %s3609_s20 }
  0x12   : > { %s249_s8 = scalar_lea.vmem %s3507_s1, %s1947_s22  ;;  %v2139_v2 = vld [vmem:[%s2133_s29] sm:$0xff]  ;;  %v2164_v12 = vld [vmem:[%s2133_s29 + $0x48] sm:$0xff]  ;;  %v2183_v19 = vld [vmem:[%s2133_s29 + $0x50] sm:$0xff] }
  0x13   : > { %3550 = vst [vmem:[#allocation2_spill] sm:$0xff] %v2139_v2  ;;  %s2144_s11 = scalar_lea.vmem %s3511_s5, %s1948_s30  ;;  %v2146_v3 = vld [vmem:[%s249_s8 + $0x10] sm:$0xf]  ;;  %v2148_v4 = vld [vmem:[%s249_s8 + $0x28] sm:$0xf]  ;;  %v2150_v5 = vld [vmem:[%s249_s8] sm:$0xff]  ;;  %v288_v31 = vmul.f32 %v2193_v21, %v2139_v2  ;;  %v297_v37 = vmul.f32 %v2193_v21, %v2164_v12  ;;  %v298_v44 = vmul.f32 %v2193_v21, %v2183_v19 }
  0x14   : > { %v395_v6 = vmul.f32 %v1960_v0, %v2146_v3  ;;  %v398_v7 = vmul.f32 %v1960_v0, %v2148_v4  ;;  %v365_v8 = vmul.f32 %v1961_v1, %v2150_v5  ;;  %v2155_v9 = vld [vmem:[%s249_s8 + $0x8] sm:$0xff]  ;;  %v2157_v10 = vld [vmem:[%s249_s8 + $0x20] sm:$0xff]  ;;  %v367_v11 = vmul.f32 %v1961_v1, %v2146_v3  ;;  %1429 = vst.msk [vmem:[%s2144_s11] sm:$0xff] %vm306_vm0, %v2139_v2  ;;  %v2185_v20 = vld [vmem:[%s249_s8 + $0x18] sm:$0xff] }
  0x15   : > { %3551 = vst [vmem:[#allocation3_spill] sm:$0xff] %v2164_v12  ;;  %v394_v13 = vmul.f32 %v1960_v0, %v2155_v9  ;;  %v2171_v14 = vld [vmem:[%s2133_s29 + $0x8] sm:$0xff]  ;;  %v397_v16 = vmul.f32 %v1960_v0, %v2157_v10  ;;  %v369_v18 = vmul.f32 %v1961_v1, %v2157_v10  ;;  %v2196_v22 = vld [vmem:[%s2133_s29 + $0x10] sm:$0xff]  ;;  %v366_v23 = vmul.f32 %v1961_v1, %v2155_v9  ;;  %v2205_v26 = vld [vmem:[%s2133_s29 + $0x58] sm:$0xff] }
  0x16   : > { %1438 = vst.msk [vmem:[%s2144_s11 + $0x120] sm:$0xff] %vm306_vm0, %v2164_v12  ;;  %1900 = vmatpush.xpose.msk.msra.mxu0 %vm306_vm0, %v395_v6  ;;  %1912 = vmatpush.xpose.msk.msra.mxu1 %vm306_vm0, %v398_v7  ;;  %v371_v15 = vsel %vm306_vm0, %v365_v8, 0.0  ;;  %v378_v17 = vsel %vm377_vm1, %v367_v11, 0.0  ;;  %v368_v25 = vmul.f32 %v1961_v1, %v2185_v20  ;;  %v2211_v27 = vld [vmem:[%s2133_s29 + $0x18] sm:$0xff]  ;;  %v393_v28 = vmul.f32 %v1960_v0, %v2150_v5  ;;  %v2221_v30 = vld [vmem:[%s2133_s29 + $0x60] sm:$0xff]  ;;  %v2243_v38 = vld [vmem:[%s2133_s29 + $0x68] sm:$0xff] }
  0x17   : > { %3552 = vst [vmem:[#allocation4_spill] sm:$0xff] %v2171_v14  ;;  %372 = vadd.xlane.f32.xlu0 %v371_v15  ;;  %379 = vadd.xlane.f32.xlu1 %v378_v17  ;;  %v384_v24 = vsel %vm306_vm0, %v369_v18, 0.0  ;;  %v396_v29 = vmul.f32 %v1960_v0, %v2185_v20  ;;  %v2229_v32 = vld [vmem:[%s2133_s29 + $0x20] sm:$0xff]  ;;  %v374_v33 = vsel %vm306_vm0, %v366_v23, 0.0  ;;  %v307_v35 = vsel %vm306_vm0, %v288_v31, 0.0  ;;  %v2253_v39 = vld [vmem:[%s2133_s29 + $0x28] sm:$0xff] }
  0x18   : > { %1430 = vst.msk [vmem:[%s2144_s11 + $0x20] sm:$0xff] %vm306_vm0, %v2171_v14  ;;  %385 = vadd.xlane.f32.xlu2 %v384_v24  ;;  %v381_v34 = vsel %vm306_vm0, %v368_v25, 0.0  ;;  %v370_v36 = vmul.f32 %v1961_v1, %v2148_v4  ;;  %v289_v40 = vmul.f32 %v2193_v21, %v2171_v14  ;;  %v335_v42 = vsel %vm306_vm0, %v297_v37, 0.0  ;;  %v2268_v46 = vld [vmem:[%s2133_s29 + $0x70] sm:$0xff]  ;;  %v2293_v54 = vld [vmem:[%s2133_s29 + $0x78] sm:$0xff]  ;;  %1924 = vmatpush.msk.msra.mxu2 %vm1082_vm7, %v2146_v3 }
  0x19   : > { %3553 = vst [vmem:[#allocation5_spill] sm:$0xff] %v2183_v19  ;;  %v290_v45 = vmul.f32 %v2193_v21, %v2196_v22  ;;  %v2278_v47 = vld [vmem:[%s2133_s29 + $0x30] sm:$0xff]  ;;  %v299_v48 = vmul.f32 %v2193_v21, %v2205_v26  ;;  %v338_v49 = vsel %vm306_vm0, %v298_v44, 0.0  ;;  %v291_v52 = vmul.f32 %v2193_v21, %v2211_v27  ;;  %v2339_v11 = vld [vmem:[%s2133_s29 + $0x38] sm:$0xff]  ;;  %v2355_v23 = vld [vmem:[%s2133_s29 + $0x40] sm:$0x1]  ;;  %1934 = vmatpush.msk.msra.mxu3 %vm1082_vm7, %v2148_v4 }
  0x1a   : > { %1439 = vst.msk [vmem:[%s2144_s11 + $0x140] sm:$0xff] %vm306_vm0, %v2183_v19  ;;  %1901 = vmatpush.xpose.msk.msra.mxu0 %vm306_vm0, %v394_v13  ;;  %1913 = vmatpush.xpose.msk.msra.mxu1 %vm306_vm0, %v397_v16  ;;  %v387_v41 = vsel %vm377_vm1, %v370_v36, 0.0  ;;  %v310_v43 = vsel %vm306_vm0, %v289_v40, 0.0  ;;  %v300_v53 = vmul.f32 %v2193_v21, %v2221_v30  ;;  %v292_v55 = vmul.f32 %v2193_v21, %v2229_v32  ;;  %v2347_v13 = vld [vmem:[%s2133_s29 + $0x80] sm:$0xff]  ;;  %v2358_v24 = vld [vmem:[%s2133_s29 + $0x88] sm:$0x1] }
  0x1b   : > { %3554 = vst [vmem:[#allocation6_spill] sm:$0xff] %v2196_v22  ;;  %v313_v50 = vsel %vm306_vm0, %v290_v45, 0.0  ;;  %v341_v51 = vsel %vm306_vm0, %v299_v48, 0.0  ;;  %v316_v56 = vsel %vm306_vm0, %v291_v52, 0.0  ;;  %v301_v59 = vmul.f32 %v2193_v21, %v2243_v38  ;;  %1100 = vmatpush.msra.mxu2 %v2155_v9  ;;  %1174 = vmatpush.msra.mxu3 %v2157_v10 }
  0x1c   : > { %1431 = vst.msk [vmem:[%s2144_s11 + $0x40] sm:$0xff] %vm306_vm0, %v2196_v22  ;;  %v344_v57 = vsel %vm306_vm0, %v300_v53, 0.0  ;;  %v319_v58 = vsel %vm306_vm0, %v292_v55, 0.0  ;;  %v293_v60 = vmul.f32 %v2193_v21, %v2253_v39  ;;  %v302_v61 = vmul.f32 %v2193_v21, %v2268_v46 }
  0x1d   : > { %3555 = vst [vmem:[#allocation7_spill] sm:$0xff] %v2205_v26  ;;  %v347_v62 = vsel %vm306_vm0, %v301_v59, 0.0  ;;  %v303_v1 = vmul.f32 %v2193_v21, %v2293_v54  ;;  %v294_v6 = vmul.f32 %v2193_v21, %v2278_v47  ;;  %v565_v18 = vlaneseq  ;;  %1101 = vmatpush.msra.mxu2 %v2150_v5  ;;  %1175 = vmatpush.msra.mxu3 %v2185_v20 }
  0x1e   : > { %1440 = vst.msk [vmem:[%s2144_s11 + $0x160] sm:$0xff] %vm306_vm0, %v2205_v26  ;;  %1902 = vmatpush.xpose.msk.msra.mxu0 %vm306_vm0, %v393_v28  ;;  %1914 = vmatpush.xpose.msk.msra.mxu1 %vm306_vm0, %v396_v29  ;;  %v322_v63 = vsel %vm306_vm0, %v293_v60, 0.0  ;;  %v350_v0 = vsel %vm306_vm0, %v302_v61, 0.0 }
  0x1f   : > { %3556 = vst [vmem:[#allocation8_spill] sm:$0xff] %v2211_v27  ;;  %375 = vadd.xlane.f32.xlu0 %v374_v33  ;;  %382 = vadd.xlane.f32.xlu1 %v381_v34  ;;  %v353_v7 = vsel %vm306_vm0, %v303_v1, 0.0  ;;  %v325_v8 = vsel %vm306_vm0, %v294_v6, 0.0  ;;  %v566_v29 = vand.u32 127, %v565_v18 }
  0x20   : > { %1432 = vst.msk [vmem:[%s2144_s11 + $0x60] sm:$0xff] %vm306_vm0, %v2211_v27  ;;  %308 = vadd.xlane.f32.xlu2 %v307_v35 }
  0x21   : > { %3557 = vst [vmem:[#allocation9_spill] sm:$0xff] %v2221_v30  ;;  %1903 = vmatmul.msk.f32.vlgmr.msra.gmra.mxu0 %vm306_vm0, %v2139_v2  ;;  %1915 = vmatmul.msk.f32.vlgmr.msra.gmra.mxu1 %vm306_vm0, %v2164_v12  ;;  %v568_v31 = vadd.s32 4294967288, %v566_v29  ;;  %v572_v35 = vadd.s32 4294967280, %v566_v29 }
  0x22   : > { %1441 = vst.msk [vmem:[%s2144_s11 + $0x180] sm:$0xff] %vm306_vm0, %v2221_v30 }
  0x23   : > { %3558 = vst [vmem:[#allocation10_spill] sm:$0xff] %v2229_v32 }
  0x24   : > { %1433 = vst.msk [vmem:[%s2144_s11 + $0x80] sm:$0xff] %vm306_vm0, %v2229_v32 }
  0x25   : > { %3559 = vst [vmem:[#allocation11_spill] sm:$0xff] %v2243_v38 }
  0x26   : > { %1442 = vst.msk [vmem:[%s2144_s11 + $0x1a0] sm:$0xff] %vm306_vm0, %v2243_v38 }
  0x27   : > { %3560 = vst [vmem:[#allocation12_spill] sm:$0xff] %v2253_v39  ;;  %388 = vadd.xlane.f32.xlu0 %v387_v41  ;;  %336 = vadd.xlane.f32.xlu1 %v335_v42 }
  0x28   : > { %1434 = vst.msk [vmem:[%s2144_s11 + $0xa0] sm:$0xff] %vm306_vm0, %v2253_v39  ;;  %311 = vadd.xlane.f32.xlu2 %v310_v43 }
  0x29   : > { %3561 = vst [vmem:[#allocation13_spill] sm:$0xff] %v2268_v46  ;;  %1904 = vmatmul.msk.f32.gmra.mxu0 %vm306_vm0, %v2171_v14  ;;  %1916 = vmatmul.msk.f32.gmra.mxu1 %vm306_vm0, %v2183_v19 }
  0x2a   : > { %1443 = vst.msk [vmem:[%s2144_s11 + $0x1c0] sm:$0xff] %vm306_vm0, %v2268_v46 }
  0x2b   : > { %3562 = vst [vmem:[#allocation14_spill] sm:$0xff] %v2278_v47 }
  0x2c   : > { %1435 = vst.msk [vmem:[%s2144_s11 + $0xc0] sm:$0xff] %vm306_vm0, %v2278_v47 }
  0x2d   : > { %3563 = vst [vmem:[#allocation15_spill] sm:$0xff] %v2293_v54 }
  0x2e   : > { %1444 = vst.msk [vmem:[%s2144_s11 + $0x1e0] sm:$0xff] %vm306_vm0, %v2293_v54 }
  0x2f   : > { %339 = vadd.xlane.f32.xlu0 %v338_v49  ;;  %314 = vadd.xlane.f32.xlu1 %v313_v50  ;;  %3564 = vst [vmem:[#allocation16_spill] sm:$0xff] %v2339_v11 }
  0x30   : > { %342 = vadd.xlane.f32.xlu2 %v341_v51  ;;  %1436 = vst.msk [vmem:[%s2144_s11 + $0xe0] sm:$0xff] %vm306_vm0, %v2339_v11 }
  0x31   : > { %1905 = vmatmul.msk.f32.gmra.mxu0 %vm306_vm0, %v2196_v22  ;;  %1917 = vmatmul.msk.f32.gmra.mxu1 %vm306_vm0, %v2205_v26  ;;  %3565 = vst [vmem:[#allocation17_spill] sm:$0xff] %v2347_v13 }
  0x32   : > { %1445 = vst.msk [vmem:[%s2144_s11 + $0x200] sm:$0xff] %vm306_vm0, %v2347_v13 }
  0x33   : > { %3566 = vst [vmem:[#allocation18_spill] sm:$0xff] %v2355_v23 }
  0x34   : > { %3567 = vst [vmem:[#allocation19_spill] sm:$0xff] %v2358_v24 }
  0x35   : > { %1437 = vst.msk [vmem:[%s2144_s11 + $0x100] sm:$0x1] %vm331_vm2, %v2355_v23 }
  0x36   : > { %1446 = vst.msk [vmem:[%s2144_s11 + $0x220] sm:$0x1] %vm331_vm2, %v2358_v24 }
  0x37   : > { %317 = vadd.xlane.f32.xlu0 %v316_v56  ;;  %345 = vadd.xlane.f32.xlu1 %v344_v57 }
  0x38   : > { %320 = vadd.xlane.f32.xlu2 %v319_v58 }
  0x39   : > { %1906 = vmatmul.msk.f32.gmra.mxu0 %vm306_vm0, %v2211_v27  ;;  %1918 = vmatmul.msk.f32.gmra.mxu1 %vm306_vm0, %v2221_v30 }
  0x3f   : > { %348 = vadd.xlane.f32.xlu0 %v347_v62  ;;  %323 = vadd.xlane.f32.xlu1 %v322_v63  ;;  %v295_v62 = vmul.f32 %v2193_v21, %v2339_v11 }
  0x40   : > { %351 = vadd.xlane.f32.xlu2 %v350_v0 }
  0x41   : > { %1907 = vmatmul.msk.f32.gmra.mxu0 %vm306_vm0, %v2229_v32  ;;  %1919 = vmatmul.msk.f32.gmra.mxu1 %vm306_vm0, %v2243_v38 }
  0x47   : > { %354 = vadd.xlane.f32.xlu0 %v353_v7 }
  0x48   : > { %326 = vadd.xlane.f32.xlu2 %v325_v8  ;;  %v328_v8 = vsel %vm306_vm0, %v295_v62, 0.0 }
  0x49   : > { %1908 = vmatmul.msk.f32.gmra.mxu0 %vm306_vm0, %v2253_v39  ;;  %1920 = vmatmul.msk.f32.gmra.mxu1 %vm306_vm0, %v2268_v46 }
  0x51   : > { %1909 = vmatmul.msk.f32.gmra.mxu0 %vm306_vm0, %v2278_v47  ;;  %1921 = vmatmul.msk.f32.gmra.mxu1 %vm306_vm0, %v2293_v54 }
  0x59   : > { %1910 = vmatmul.msk.f32.gmra.mxu0 %vm306_vm0, %v2339_v11  ;;  %1922 = vmatmul.msk.f32.gmra.mxu1 %vm306_vm0, %v2347_v13 }
  0x61   : > { %1911 = vmatmul.msk.f32.gmra.mxu0 %vm306_vm0, %v2355_v23  ;;  %1923 = vmatmul.msk.f32.gmra.mxu1 %vm306_vm0, %v2358_v24 }
  0x8a   : > { %v373_v15 = vpop.xlane.xlu0 %372  ;;  %v380_v16 = vpop.xlane.xlu1 %379 }
  0x8b   : > { %v386_v17 = vpop.xlane.xlu2 %385  ;;  %v567_v37 = vperm.slane %v373_v15, %v566_v29  ;;  %v573_v45 = vperm.slane %v380_v16, %v572_v35 }
  0x8c   : > { %v577_v40 = vperm.slane %v386_v17, %v568_v31 }
  0x92   : > { %v376_v25 = vpop.xlane.xlu0 %375  ;;  %v383_v28 = vpop.xlane.xlu1 %382 }
  0x93   : > { %v309_v33 = vpop.xlane.xlu2 %308  ;;  %v569_v34 = vperm.slane %v376_v25, %v568_v31  ;;  %v576_v41 = vperm.slane %v383_v28, %v566_v29  ;;  %v304_v31 = vmul.f32 %v2193_v21, %v2347_v13 }
  0x95   : > { %v571_v44 = vsel %vm570_vm3, %v569_v34, %v567_v37  ;;  %v578_v50 = vsel %vm570_vm3, %v577_v40, %v576_v41  ;;  %v356_v37 = vsel %vm306_vm0, %v304_v31, 0.0 }
  0x96   : > { %v2370_v53 = vsel %vm574_vm4, %v573_v45, %v571_v44 }
  0x9a   : > { %v389_v36 = vpop.xlane.xlu0 %388  ;;  %v337_v43 = vpop.xlane.xlu1 %336 }
  0x9b   : > { %v579_v42 = vperm.slane %v389_v36, %v572_v35  ;;  %v312_v58 = vpop.xlane.xlu2 %311 }
  0x9d   : > { %v2372_v55 = vsel %vm574_vm4, %v579_v42, %v578_v50 }
  0x9e   : > { %v532_v48 = vpop.f32.mrf.mxu1  ;;  %v452_v49 = vpop.f32.mrf.mxu0 }
  0x9f   : > { %v533_v51 = vadd.f32 %v532_v48, %v337_v43  ;;  %v453_v52 = vadd.f32 %v452_v49, %v309_v33  ;;  %v305_v43 = vmul.f32 %v2193_v21, %v2358_v24  ;;  %v296_v48 = vmul.f32 %v2193_v21, %v2355_v23 }
  0xa1   : > { %v2375_v56 = vadd.f32 %v2372_v55, %v533_v51  ;;  %v2378_v57 = vadd.f32 %v2370_v53, %v453_v52  ;;  %v359_v52 = vsel %vm331_vm2, %v305_v43, 0.0 }
  0xa2   : > { %v340_v61 = vpop.xlane.xlu0 %339  ;;  %v315_v18 = vpop.xlane.xlu1 %314 }
  0xa3   : > { %v650_v59 = vsel %vm621_vm5, %v2375_v56, -inf  ;;  %v622_v60 = vsel %vm621_vm5, %v2378_v57, -inf  ;;  %v343_v25 = vpop.xlane.xlu2 %342 }
  0xa4   : > { %651 = vmax.xlane.f32.xlu1 %v650_v59  ;;  %623 = vmax.xlane.f32.xlu0 %v622_v60  ;;  %v332_v59 = vsel %vm331_vm2, %v296_v48, 0.0 }
  0xa6   : > { %v455_v63 = vpop.f32.mrf.mxu0  ;;  %v535_v0 = vpop.f32.mrf.mxu1 }
  0xa7   : > { %v536_v1 = vadd.f32 %v535_v0, %v340_v61  ;;  %v456_v6 = vadd.f32 %v455_v63, %v312_v58 }
  0xa9   : > { %v2387_v7 = vadd.f32 %v2372_v55, %v536_v1  ;;  %v2391_v15 = vadd.f32 %v2370_v53, %v456_v6 }
  0xaa   : > { %v318_v40 = vpop.xlane.xlu0 %317  ;;  %v346_v51 = vpop.xlane.xlu1 %345 }
  0xab   : > { %v653_v16 = vsel %vm621_vm5, %v2387_v7, -inf  ;;  %v625_v17 = vsel %vm621_vm5, %v2391_v15, -inf  ;;  %v321_v50 = vpop.xlane.xlu2 %320 }
  0xac   : > { %654 = vmax.xlane.f32.xlu2 %v653_v16  ;;  %329 = vadd.xlane.f32.xlu0 %v328_v8 }
  0xad   : > { %626 = vmax.xlane.f32.xlu1 %v625_v17 }
  0xae   : > { %v538_v28 = vpop.f32.mrf.mxu1  ;;  %v458_v29 = vpop.f32.mrf.mxu0 }
  0xaf   : > { %v459_v33 = vadd.f32 %v458_v29, %v315_v18  ;;  %v539_v34 = vadd.f32 %v538_v28, %v343_v25 }
  0xb1   : > { %v2400_v35 = vadd.f32 %v2370_v53, %v459_v33  ;;  %v2403_v36 = vadd.f32 %v2372_v55, %v539_v34 }
  0xb2   : > { %v349_v62 = vpop.xlane.xlu0 %348  ;;  %v324_v29 = vpop.xlane.xlu1 %323 }
  0xb3   : > { %v628_v41 = vsel %vm621_vm5, %v2400_v35, -inf  ;;  %v656_v42 = vsel %vm621_vm5, %v2403_v36, -inf  ;;  %v352_v17 = vpop.xlane.xlu2 %351 }
  0xb4   : > { %629 = vmax.xlane.f32.xlu2 %v628_v41  ;;  %657 = vmax.xlane.f32.xlu0 %v656_v42 }
  0xb5   : > { %357 = vadd.xlane.f32.xlu1 %v356_v37 }
  0xb6   : > { %v541_v44 = vpop.f32.mrf.mxu1  ;;  %v461_v45 = vpop.f32.mrf.mxu0 }
  0xb7   : > { %v462_v49 = vadd.f32 %v461_v45, %v318_v40  ;;  %v542_v61 = vadd.f32 %v541_v44, %v346_v51 }
  0xb9   : > { %v2416_v58 = vadd.f32 %v2370_v53, %v462_v49  ;;  %v2422_v6 = vadd.f32 %v2372_v55, %v542_v61 }
  0xba   : > { %v355_v44 = vpop.xlane.xlu0 %354 }
  0xbb   : > { %v631_v60 = vsel %vm621_vm5, %v2416_v58, -inf  ;;  %v659_v28 = vsel %vm621_vm5, %v2422_v6, -inf  ;;  %v327_v45 = vpop.xlane.xlu2 %326 }
  0xbc   : > { %360 = vadd.xlane.f32.xlu2 %v359_v52  ;;  %632 = vmax.xlane.f32.xlu0 %v631_v60 }
  0xbd   : > { %333 = vadd.xlane.f32.xlu1 %v332_v59 }
  0xbe   : > { %v544_v63 = vpop.f32.mrf.mxu1  ;;  %v464_v21 = vpop.f32.mrf.mxu0 }
  0xbf   : > { %v545_v0 = vadd.f32 %v544_v63, %v349_v62  ;;  %v465_v1 = vadd.f32 %v464_v21, %v321_v50 }
  0xc1   : > { %v2425_v8 = vadd.f32 %v2372_v55, %v545_v0  ;;  %v2428_v16 = vadd.f32 %v2370_v53, %v465_v1 }
  0xc3   : > { %v662_v18 = vsel %vm621_vm5, %v2425_v8, -inf  ;;  %v634_v25 = vsel %vm621_vm5, %v2428_v16, -inf }
  0xc4   : > { %663 = vmax.xlane.f32.xlu0 %v662_v18  ;;  %635 = vmax.xlane.f32.xlu2 %v634_v25 }
  0xc5   : > { %660 = vmax.xlane.f32.xlu1 %v659_v28 }
  0xc6   : > { %v547_v31 = vpop.f32.mrf.mxu1  ;;  %v467_v33 = vpop.f32.mrf.mxu0 }
  0xc7   : > { %v468_v34 = vadd.f32 %v467_v33, %v324_v29  ;;  %v548_v37 = vadd.f32 %v547_v31, %v352_v17 }
  0xc9   : > { %v2437_v40 = vadd.f32 %v2370_v53, %v468_v34  ;;  %v2440_v41 = vadd.f32 %v2372_v55, %v548_v37 }
  0xcb   : > { %v637_v42 = vsel %vm621_vm5, %v2437_v40, -inf  ;;  %v665_v43 = vsel %vm621_vm5, %v2440_v41, -inf }
  0xcc   : > { %666 = vmax.xlane.f32.xlu2 %v665_v43 }
  0xcd   : > { %638 = vmax.xlane.f32.xlu1 %v637_v42 }
  0xce   : > { %v550_v48 = vpop.f32.mrf.mxu1  ;;  %v470_v49 = vpop.f32.mrf.mxu0 }
  0xcf   : > { %v551_v50 = vadd.f32 %v550_v48, %v355_v44  ;;  %v471_v51 = vadd.f32 %v470_v49, %v327_v45 }
  0xd1   : > { %v2447_v52 = vadd.f32 %v2372_v55, %v551_v50  ;;  %v2450_v59 = vadd.f32 %v2370_v53, %v471_v51 }
  0xd3   : > { %v668_v60 = vsel %vm621_vm5, %v2447_v52, -inf  ;;  %v640_v61 = vsel %vm621_vm5, %v2450_v59, -inf }
  0xd4   : > { %641 = vmax.xlane.f32.xlu0 %v640_v61 }
  0xd5   : > { %669 = vmax.xlane.f32.xlu1 %v668_v60 }
  0xd6   : > { %v473_v18 = vpop.f32.mrf.mxu0  ;;  %v553_v45 = vpop.f32.mrf.mxu1 }
 0x117   : > { %v2456_v62 = vpop.xlane.xlu1 %651  ;;  %v2458_v63 = vpop.xlane.xlu0 %623 }
 0x118   : > { %v686_v21 = vsub.f32 %v2375_v56, %v2456_v62  ;;  %v677_v0 = vsub.f32 %v2378_v57, %v2458_v63 }
 0x11a   : > { %v713_v1 = vmul.f32 1.442695, %v686_v21  ;;  %v695_v17 = vmul.f32 1.442695, %v677_v0 }
 0x11c   : > { %1963 = vpow2.f32 %v713_v1 }
 0x11d   : > { %1965 = vpow2.f32 %v695_v17 }
 0x11f   : > { %v330_v25 = vpop.xlane.xlu0 %329  ;;  %v2464_v28 = vpop.xlane.xlu2 %654 }
 0x120   : > { %v474_v29 = vadd.f32 %v473_v18, %v330_v25  ;;  %v2466_v31 = vpop.xlane.xlu1 %626  ;;  %v687_v33 = vsub.f32 %v2387_v7, %v2464_v28 }
 0x121   : > { %v678_v56 = vsub.f32 %v2391_v15, %v2466_v31 }
 0x122   : > { %v2472_v34 = vpop.eup %1963  ;;  %v715_v57 = vmul.f32 1.442695, %v687_v33  ;;  %v2475_v37 = vadd.f32 %v2370_v53, %v474_v29  ;;  %v556_v29 = vpop.f32.mrf.mxu1 }
 0x123   : > { %v2477_v42 = vpop.eup %1965  ;;  %v697_v43 = vmul.f32 1.442695, %v678_v56  ;;  %v758_v44 = vsel %vm621_vm5, %v2472_v34, 0.0  ;;  %v476_v33 = vpop.f32.mrf.mxu0 }
 0x124   : > { %1967 = vpow2.f32 %v715_v57  ;;  %v731_v7 = vsel %vm621_vm5, %v2477_v42, 0.0  ;;  %759 = vadd.xlane.f32.xlu0 %v758_v44  ;;  %v643_v15 = vsel %vm621_vm5, %v2475_v37, -inf }
 0x125   : > { %1969 = vpow2.f32 %v697_v43  ;;  %732 = vadd.xlane.f32.xlu2 %v731_v7  ;;  %644 = vmax.xlane.f32.xlu1 %v643_v15 }
 0x127   : > { %v2485_v48 = vpop.xlane.xlu0 %657  ;;  %v2487_v49 = vpop.xlane.xlu2 %629 }
 0x128   : > { %v358_v50 = vpop.xlane.xlu1 %357  ;;  %v679_v51 = vsub.f32 %v2400_v35, %v2487_v49  ;;  %v688_v1 = vsub.f32 %v2403_v36, %v2485_v48  ;;  %v1220_v4 = vmax.f32 %v2456_v62, %v2485_v48  ;;  %v1204_v9 = vmax.f32 %v2458_v63, %v2487_v49 }
 0x129   : > { %v554_v60 = vadd.f32 %v553_v45, %v358_v50 }
 0x12a   : > { %v2491_v61 = vpop.eup %1967  ;;  %v699_v21 = vmul.f32 1.442695, %v679_v51  ;;  %v717_v56 = vmul.f32 1.442695, %v688_v1 }
 0x12b   : > { %v2493_v0 = vpop.eup %1969  ;;  %v2498_v17 = vadd.f32 %v2372_v55, %v554_v60  ;;  %v761_v18 = vsel %vm621_vm5, %v2491_v61, 0.0 }
 0x12c   : > { %v734_v25 = vsel %vm621_vm5, %v2493_v0, 0.0  ;;  %1971 = vpow2.f32 %v699_v21 }
 0x12d   : > { %735 = vadd.xlane.f32.xlu0 %v734_v25  ;;  %v671_v35 = vsel %vm621_vm5, %v2498_v17, -inf  ;;  %762 = vadd.xlane.f32.xlu1 %v761_v18  ;;  %1973 = vpow2.f32 %v717_v56 }
 0x12e   : > { %672 = vmax.xlane.f32.xlu2 %v671_v35 }
 0x12f   : > { %v2506_v36 = vpop.xlane.xlu0 %632  ;;  %v361_v57 = vpop.xlane.xlu2 %360 }
 0x130   : > { %v334_v43 = vpop.xlane.xlu1 %333  ;;  %v680_v44 = vsub.f32 %v2416_v58, %v2506_v36  ;;  %v557_v45 = vadd.f32 %v556_v29, %v361_v57  ;;  %v1205_v20 = vmax.f32 %v2466_v31, %v2506_v36 }
 0x131   : > { %v477_v7 = vadd.f32 %v476_v33, %v334_v43 }
 0x132   : > { %v701_v15 = vmul.f32 1.442695, %v680_v44  ;;  %v2511_v50 = vadd.f32 %v2372_v55, %v557_v45  ;;  %v2513_v51 = vpop.eup %1971 }
 0x133   : > { %v2516_v60 = vadd.f32 %v2370_v53, %v477_v7  ;;  %v737_v21 = vsel %vm621_vm5, %v2513_v51, 0.0  ;;  %v2534_v29 = vpop.eup %1973 }
 0x134   : > { %1975 = vpow2.f32 %v701_v15  ;;  %v674_v58 = vsel %vm646_vm6, %v2511_v50, -inf }
 0x135   : > { %v647_v1 = vsel %vm646_vm6, %v2516_v60, -inf  ;;  %738 = vadd.xlane.f32.xlu1 %v737_v21  ;;  %675 = vmax.xlane.f32.xlu0 %v674_v58 }
 0x136   : > { %648 = vmax.xlane.f32.xlu2 %v647_v1 }
 0x137   : > { %v2524_v55 = vpop.xlane.xlu0 %663  ;;  %v2526_v18 = vpop.xlane.xlu2 %635 }
 0x138   : > { %v2528_v25 = vpop.xlane.xlu1 %660  ;;  %v690_v53 = vsub.f32 %v2425_v8, %v2524_v55  ;;  %v681_v35 = vsub.f32 %v2428_v16, %v2526_v18  ;;  %v764_v8 = vsel %vm621_vm5, %v2534_v29, 0.0 }
 0x139   : > { %v689_v33 = vsub.f32 %v2422_v6, %v2528_v25  ;;  %v1221_v5 = vmax.f32 %v2464_v28, %v2528_v25 }
 0x13a   : > { %v2538_v56 = vpop.eup %1975  ;;  %v721_v57 = vmul.f32 1.442695, %v690_v53  ;;  %v703_v43 = vmul.f32 1.442695, %v681_v35 }
 0x13b   : > { %v719_v44 = vmul.f32 1.442695, %v689_v33  ;;  %v740_v45 = vsel %vm621_vm5, %v2538_v56, 0.0 }
 0x13c   : > { %1977 = vpow2.f32 %v721_v57 }
 0x13d   : > { %1979 = vpow2.f32 %v719_v44  ;;  %741 = vadd.xlane.f32.xlu0 %v740_v45 }
 0x13e   : > { %1981 = vpow2.f32 %v703_v43  ;;  %765 = vadd.xlane.f32.xlu2 %v764_v8 }
 0x13f   : > { %v2544_v16 = vpop.xlane.xlu2 %666 }
 0x140   : > { %v2546_v7 = vpop.xlane.xlu1 %638  ;;  %v691_v6 = vsub.f32 %v2440_v41, %v2544_v16 }
 0x141   : > { %v682_v15 = vsub.f32 %v2437_v40, %v2546_v7 }
 0x142   : > { %v2552_v21 = vpop.eup %1977  ;;  %v723_v58 = vmul.f32 1.442695, %v691_v6 }
 0x143   : > { %v2554_v1 = vpop.eup %1979  ;;  %v705_v53 = vmul.f32 1.442695, %v682_v15  ;;  %v770_v35 = vsel %vm621_vm5, %v2552_v21, 0.0 }
 0x144   : > { %v2558_v33 = vpop.eup %1981  ;;  %1983 = vpow2.f32 %v723_v58  ;;  %v767_v57 = vsel %vm621_vm5, %v2554_v1, 0.0 }
 0x145   : > { %1985 = vpow2.f32 %v705_v53  ;;  %768 = vadd.xlane.f32.xlu1 %v767_v57  ;;  %771 = vadd.xlane.f32.xlu0 %v770_v35  ;;  %v743_v40 = vsel %vm621_vm5, %v2558_v33, 0.0 }
 0x146   : > { %744 = vadd.xlane.f32.xlu2 %v743_v40 }
 0x147   : > { %v2564_v41 = vpop.xlane.xlu0 %641 }
 0x148   : > { %v2566_v43 = vpop.xlane.xlu1 %669  ;;  %v683_v44 = vsub.f32 %v2450_v59, %v2564_v41 }
 0x149   : > { %v692_v45 = vsub.f32 %v2447_v52, %v2566_v43 }
 0x14a   : > { %v2572_v8 = vpop.eup %1983  ;;  %v707_v6 = vmul.f32 1.442695, %v683_v44 }
 0x14b   : > { %v2574_v15 = vpop.eup %1985  ;;  %v725_v58 = vmul.f32 1.442695, %v692_v45  ;;  %v773_v53 = vsel %vm621_vm5, %v2572_v8, 0.0 }
 0x14c   : > { %1987 = vpow2.f32 %v707_v6  ;;  %v746_v35 = vsel %vm621_vm5, %v2574_v15, 0.0 }
 0x14d   : > { %1989 = vpow2.f32 %v725_v58  ;;  %747 = vadd.xlane.f32.xlu1 %v746_v35 }
 0x14e   : > { %774 = vadd.xlane.f32.xlu2 %v773_v53  ;;  %v2607_v53 = vmax.f32 %v1220_v4, %v2524_v55 }
 0x152   : > { %v2580_v59 = vpop.eup %1987 }
 0x153   : > { %v2582_v57 = vpop.eup %1989  ;;  %v749_v52 = vsel %vm621_vm5, %v2580_v59, 0.0 }
 0x154   : > { %3568 = vst [vmem:[#allocation20_spill] sm:$0xff] %v2582_v57  ;;  %v776_v40 = vsel %vm621_vm5, %v2582_v57, 0.0  ;;  %750 = vadd.xlane.f32.xlu0 %v749_v52  ;;  %v2615_v52 = vmax.f32 %v1221_v5, %v2544_v16 }
 0x155   : > { %777 = vadd.xlane.f32.xlu1 %v776_v40 }
 0x197   : > { %v760_v44 = vpop.xlane.xlu0 %759 }
 0x198   : > { %1991 = vrcp.f32 %v760_v44  ;;  %v733_v45 = vpop.xlane.xlu2 %732  ;;  %v2594_v6 = vpop.xlane.xlu1 %644  ;;  %v922_v39 = vand.u32 2147483648, %v760_v44  ;;  %vm916_vm10 = vweird.f32 %v760_v44 }
 0x199   : > { %1993 = vrcp.f32 %v733_v45  ;;  %v684_v58 = vsub.f32 %v2475_v37, %v2594_v6  ;;  %v2610_v37 = vmax.f32 %v1204_v9, %v2526_v18  ;;  %v796_v32 = vand.u32 2147483648, %v733_v45 }
 0x19a   : > { %v794_v14 = vand.u32 2147483647, %v733_v45  ;;  %vm790_vm11 = vweird.f32 %v733_v45 }
 0x19b   : > { %v709_v3 = vmul.f32 1.442695, %v684_v58  ;;  %v2618_v58 = vmax.f32 %v1205_v20, %v2546_v7  ;;  %v1208_v23 = vmax.f32 %v2610_v37, %v2564_v41  ;;  %v797_v54 = vor.u32 1.1754944e-38, %v796_v32 }
 0x19c   : > { %vm2655_vm15 = vcmp.eq.f32.partialorder %v794_v14, 8.507059e+37 }
 0x19d   : > { %1995 = vpow2.f32 %v709_v3  ;;  %v1224_v3 = vmax.f32 %v2607_v53, %v2566_v43  ;;  %v920_v53 = vand.u32 2147483647, %v760_v44 }
 0x19e   : > { %v1992_v10 = vpop.eup %1991 }
 0x19f   : > { %v2612_v35 = vpop.eup %1993  ;;  %v912_v40 = vmul.f32 %v1992_v10, %v760_v44  ;;  %vm917_vm9 = vweird.f32 %v1992_v10  ;;  %vm2648_vm14 = vcmp.eq.f32.partialorder %v920_v53, 8.507059e+37 }
 0x1a0   : > { %v786_v4 = vmul.f32 %v2612_v35, %v733_v45  ;;  %v2625_v11 = vpop.xlane.xlu0 %735  ;;  %v2627_v9 = vpop.xlane.xlu1 %762  ;;  %vm791_vm12 = vweird.f32 %v2612_v35  ;;  %vm2644_vm13 = vmor %vm916_vm10, %vm917_vm9 }
 0x1a1   : > { %v913_v47 = vsub.f32 1.0, %v912_v40  ;;  %1997 = vrcp.f32 %v2625_v11  ;;  %v2630_v5 = vpop.xlane.xlu2 %672  ;;  %vm2675_vm1 = vmor %vm790_vm11, %vm791_vm12  ;;  %vm804_vm7 = vweird.f32 %v2625_v11  ;;  %vm930_vm9 = vweird.f32 %v2627_v9 }
 0x1a2   : > { %v787_v20 = vsub.f32 1.0, %v786_v4  ;;  %1999 = vrcp.f32 %v2627_v9  ;;  %v693_v22 = vsub.f32 %v2498_v17, %v2630_v5  ;;  %v923_v4 = vor.u32 1.1754944e-38, %v922_v39 }
 0x1a3   : > { %v2633_v27 = vpop.eup %1995  ;;  %v914_v37 = vmul.f32 %v1992_v10, %v913_v47  ;;  %v1209_v47 = vmax.f32 %v2618_v58, %v2594_v6 }
 0x1a4   : > { %3569 = vst [vmem:[#allocation21_spill] sm:$0xff] %v2633_v27  ;;  %v788_v40 = vmul.f32 %v2612_v35, %v787_v20  ;;  %v752_v2 = vsel %vm621_vm5, %v2633_v27, 0.0  ;;  %v727_v24 = vmul.f32 1.442695, %v693_v22 }
 0x1a5   : > { %753 = vadd.xlane.f32.xlu2 %v752_v2  ;;  %v915_v13 = vadd.f32 %v1992_v10, %v914_v37  ;;  %v810_v2 = vand.u32 2147483648, %v2625_v11  ;;  %v936_v37 = vand.u32 2147483648, %v2627_v9 }
 0x1a6   : > { %v789_v17 = vadd.f32 %v2612_v35, %v788_v40  ;;  %2001 = vpow2.f32 %v727_v24  ;;  %v1225_v40 = vmax.f32 %v2615_v52, %v2630_v5 }
 0x1a7   : > { %v2652_v39 = vpop.eup %1997  ;;  %v919_v32 = vsel %vm2644_vm13, %v1992_v10, %v915_v13  ;;  %v808_v13 = vand.u32 2147483647, %v2625_v11 }
 0x1a8   : > { %v2661_v58 = vpop.eup %1999  ;;  %v800_v53 = vmul.f32 %v2652_v39, %v2625_v11  ;;  %v2668_v27 = vpop.xlane.xlu1 %738  ;;  %v793_v52 = vsel %vm2675_vm1, %v2612_v35, %v789_v17  ;;  %v924_v45 = vsel %vm2648_vm14, %v923_v4, %v919_v32  ;;  %v934_v35 = vand.u32 2147483647, %v2627_v9 }
 0x1a9   : > { %v2670_v24 = vpop.xlane.xlu0 %675  ;;  %v926_v10 = vmul.f32 %v2661_v58, %v2627_v9  ;;  %2003 = vrcp.f32 %v2668_v27  ;;  %v2683_v44 = vpop.xlane.xlu2 %648  ;;  %vm805_vm3 = vweird.f32 %v2652_v39  ;;  %vm931_vm4 = vweird.f32 %v2661_v58 }
 0x1aa   : > { %v801_v57 = vsub.f32 1.0, %v800_v53  ;;  %v694_v46 = vsub.f32 %v2511_v50, %v2670_v24  ;;  %v1226_v38 = vsel %vm1210_vm8, %v2670_v24, -inf  ;;  %v685_v30 = vsub.f32 %v2516_v60, %v2683_v44  ;;  %vm806_vm10 = vmor %vm804_vm7, %vm805_vm3 }
 0x1ab   : > { %v927_v26 = vsub.f32 1.0, %v926_v10  ;;  %v1227_v19 = vmax.f32 %v1224_v3, %v1226_v38  ;;  %v1211_v12 = vsel %vm1210_vm8, %v2683_v44, -inf  ;;  %v798_v60 = vsel %vm2655_vm15, %v797_v54, %v793_v52  ;;  %vm932_vm12 = vmor %vm930_vm9, %vm931_vm4 }
 0x1ac   : > { %v802_v17 = vmul.f32 %v2652_v39, %v801_v57  ;;  %v729_v4 = vmul.f32 1.442695, %v694_v46  ;;  %v711_v20 = vmul.f32 1.442695, %v685_v30  ;;  %v1212_v32 = vmax.f32 %v1208_v23, %v1211_v12  ;;  %v2700_v53 = vpop.eup %2001 }
 0x1ad   : > { %v928_v50 = vmul.f32 %v2661_v58, %v927_v26  ;;  %v1228_v14 = vmax.f32 %v1227_v19, %v1225_v40  ;;  %v1046_v38 = vmul.f32 %v2472_v34, %v924_v45  ;;  %v1037_v10 = vmul.f32 %v2477_v42, %v798_v60 }
 0x1ae   : > { %2005 = vpow2.f32 %v729_v4  ;;  %v1213_v3 = vmax.f32 %v1212_v32, %v1209_v47  ;;  %v779_v57 = vsel %vm621_vm5, %v2700_v53, 0.0  ;;  %v803_v19 = vadd.f32 %v2652_v39, %v802_v17 }
 0x1af   : > { %v2709_v46 = vpop.eup %2003  ;;  %v1229_v12 = vrot.slane %v1228_v14, 4  ;;  %2007 = vpow2.f32 %v711_v20  ;;  %1935 = vmatmul.msk.f32.vlgmr.msra.gmra.mxu3 %vm621_vm5, %v1046_v38  ;;  %780 = vadd.xlane.f32.xlu0 %v779_v57  ;;  %v929_v30 = vadd.f32 %v2661_v58, %v928_v50  ;;  %v811_v42 = vor.u32 1.1754944e-38, %v810_v2 }
 0x1b0   : > { %v1214_v26 = vrot.slane %v1213_v3, 4  ;;  %1925 = vmatmul.msk.f32.vlgmr.msra.gmra.mxu2 %vm621_vm5, %v1037_v10  ;;  %v814_v54 = vmul.f32 %v2709_v46, %v2668_v27  ;;  %v937_v47 = vor.u32 1.1754944e-38, %v936_v37  ;;  %v807_v52 = vsel %vm806_vm10, %v2652_v39, %v803_v19 }
 0x1b1   : > { %v1230_v23 = vmax.f32 %v1228_v14, %v1229_v12  ;;  %v2720_v34 = vpop.xlane.xlu0 %741  ;;  %vm809_vm11 = vcmp.eq.f32.partialorder %v808_v13, 8.507059e+37  ;;  %vm935_vm13 = vcmp.eq.f32.partialorder %v934_v35, 8.507059e+37  ;;  %v933_v4 = vsel %vm932_vm12, %v2661_v58, %v929_v30  ;;  %v2731_v39 = vpop.xlane.xlu2 %765 }
 0x1b2   : > { %v1215_v22 = vmax.f32 %v1213_v3, %v1214_v26  ;;  %2009 = vrcp.f32 %v2720_v34  ;;  %v812_v17 = vsel %vm809_vm11, %v811_v42, %v807_v52  ;;  %v815_v9 = vsub.f32 1.0, %v814_v54 }
 0x1b3   : > { %v1231_v40 = vrot.slane %v1230_v23, 2  ;;  %v1038_v20 = vmul.f32 %v2493_v0, %v812_v17  ;;  %v938_v32 = vsel %vm935_vm13, %v937_v47, %v933_v4  ;;  %v824_v58 = vand.u32 2147483648, %v2668_v27 }
 0x1b4   : > { %v2724_v45 = vpop.eup %2005  ;;  %v1216_v11 = vrot.slane %v1215_v22, 2  ;;  %v1047_v13 = vmul.f32 %v2491_v61, %v938_v32  ;;  %v838_v61 = vand.u32 2147483648, %v2720_v34  ;;  %2011 = vrcp.f32 %v2731_v39 }
 0x1b5   : > { %v2728_v2 = vpop.eup %2007  ;;  %v1232_v37 = vmax.f32 %v1230_v23, %v1231_v40  ;;  %v782_v35 = vsel %vm646_vm6, %v2724_v45, 0.0  ;;  %v816_v10 = vmul.f32 %v2709_v46, %v815_v9  ;;  %v950_v57 = vand.u32 2147483648, %v2731_v39 }
 0x1b6   : > { %v1217_v50 = vmax.f32 %v1215_v22, %v1216_v11  ;;  %v755_v14 = vsel %vm646_vm6, %v2728_v2, 0.0  ;;  %783 = vadd.xlane.f32.xlu2 %v782_v35  ;;  %v2755_v30 = vor.u32 1.1754944e-38, %v824_v58  ;;  %v2763_v40 = vor.u32 1.1754944e-38, %v838_v61 }
 0x1b7   : > { %v1233_v60 = vrot.slane %v1232_v37, 1  ;;  %756 = vadd.xlane.f32.xlu1 %v755_v14  ;;  %1936 = vmatmul.msk.f32.gmra.mxu3 %vm621_vm5, %v1047_v13  ;;  %v2767_v52 = vor.u32 1.1754944e-38, %v950_v57  ;;  %v2772_v11 = vadd.f32 %v2709_v46, %v816_v10  ;;  %vm819_vm6 = vweird.f32 %v2709_v46 }
 0x1b8   : > { %v1218_v38 = vrot.slane %v1217_v50, 1  ;;  %1926 = vmatmul.msk.f32.gmra.mxu2 %vm621_vm5, %v1038_v20  ;;  %v2745_v3 = vpop.eup %2009  ;;  %v836_v20 = vand.u32 2147483647, %v2720_v34  ;;  %vm818_vm14 = vweird.f32 %v2668_v27  ;;  %vm832_vm15 = vweird.f32 %v2720_v34 }
 0x1b9   : > { %v2741_v0 = vmax.f32 %v1232_v37, %v1233_v60  ;;  %v2780_v17 = vmul.f32 %v2745_v3, %v2720_v34  ;;  %v2786_v37 = vpop.xlane.xlu0 %771  ;;  %vm2842_vm1 = vmor %vm818_vm14, %vm819_vm6  ;;  %vm944_vm3 = vweird.f32 %v2731_v39  ;;  %vm833_vm7 = vweird.f32 %v2745_v3 }
 0x1ba   : > { %v2759_v23 = vmax.f32 %v1217_v50, %v1218_v38  ;;  %v948_v50 = vand.u32 2147483647, %v2731_v39  ;;  %vm834_vm9 = vmor %vm832_vm15, %vm833_vm7  ;;  %vm837_vm10 = vcmp.eq.f32.partialorder %v836_v20, 8.507059e+37 }
 0x1bb   : > { %v1244_v12 = vsub.f32 %v2456_v62, %v2741_v0  ;;  %v1245_v19 = vsub.f32 %v2464_v28, %v2741_v0  ;;  %v1246_v26 = vsub.f32 %v2485_v48, %v2741_v0  ;;  %v1247_v54 = vsub.f32 %v2528_v25, %v2741_v0  ;;  %v2769_v48 = vpop.xlane.xlu1 %768  ;;  %v2774_v25 = vpop.eup %2011 }
 0x1bc   : > { %v1248_v42 = vsub.f32 %v2524_v55, %v2741_v0  ;;  %v1249_v62 = vsub.f32 %v2544_v16, %v2741_v0  ;;  %v1252_v55 = vsub.f32 %v2670_v24, %v2741_v0  ;;  %v822_v16 = vand.u32 2147483647, %v2668_v27 }
 0x1bd   : > { %v1271_v47 = vmul.f32 1.442695, %v1244_v12  ;;  %v1273_v22 = vmul.f32 1.442695, %v1245_v19  ;;  %v1275_v28 = vmul.f32 1.442695, %v1246_v26  ;;  %v1235_v9 = vsub.f32 %v2458_v63, %v2759_v23 }
 0x1be   : > { %v1277_v4 = vmul.f32 1.442695, %v1247_v54  ;;  %v1279_v24 = vmul.f32 1.442695, %v1248_v42  ;;  %v1236_v32 = vsub.f32 %v2466_v31, %v2759_v23  ;;  %v1250_v13 = vsub.f32 %v2566_v43, %v2741_v0  ;;  %v2825_v54 = vpop.xlane.xlu2 %744 }
 0x1bf   : > { %2013 = vpow2.f32 %v1271_v47  ;;  %v1281_v35 = vmul.f32 1.442695, %v1249_v62  ;;  %v2798_v63 = vmul.f32 %v2774_v25, %v2731_v39  ;;  %v1287_v14 = vmul.f32 1.442695, %v1252_v55 }
 0x1c0   : > { %2015 = vpow2.f32 %v1273_v22  ;;  %v1237_v60 = vsub.f32 %v2487_v49, %v2759_v23  ;;  %v829_v58 = vsub.f32 1.0, %v2780_v17  ;;  %v1251_v31 = vsub.f32 %v2630_v5, %v2741_v0 }
 0x1c1   : > { %2017 = vrcp.f32 %v2769_v48  ;;  %v1238_v43 = vsub.f32 %v2506_v36, %v2759_v23  ;;  %v1253_v38 = vmul.f32 1.442695, %v1235_v9  ;;  %v1239_v10 = vsub.f32 %v2526_v18, %v2759_v23 }
 0x1c2   : > { %2019 = vpow2.f32 %v1275_v28  ;;  %v1240_v49 = vsub.f32 %v2546_v7, %v2759_v23  ;;  %v1255_v57 = vmul.f32 1.442695, %v1236_v32  ;;  %v1283_v19 = vmul.f32 1.442695, %v1250_v13 }
 0x1c3   : > { %2021 = vrcp.f32 %v2786_v37  ;;  %v1241_v5 = vsub.f32 %v2564_v41, %v2759_v23  ;;  %v1242_v36 = vsub.f32 %v2594_v6, %v2759_v23  ;;  %v1257_v26 = vmul.f32 1.442695, %v1237_v60 }
 0x1c4   : > { %2023 = vpow2.f32 %v1277_v4  ;;  %v964_v7 = vand.u32 2147483648, %v2769_v48  ;;  %v1285_v47 = vmul.f32 1.442695, %v1251_v31  ;;  %v1243_v41 = vsub.f32 %v2683_v44, %v2759_v23 }
 0x1c5   : > { %v2808_v61 = vpop.eup %2013  ;;  %2025 = vpow2.f32 %v1279_v24  ;;  %v1259_v22 = vmul.f32 1.442695, %v1238_v43  ;;  %v1261_v28 = vmul.f32 1.442695, %v1239_v10  ;;  %v1263_v55 = vmul.f32 1.442695, %v1240_v49 }
 0x1c6   : > { %v2814_v12 = vpop.eup %2015  ;;  %2027 = vpow2.f32 %v1281_v35  ;;  %v1265_v4 = vmul.f32 1.442695, %v1241_v5  ;;  %v1267_v9 = vmul.f32 1.442695, %v1242_v36  ;;  %v941_v24 = vsub.f32 1.0, %v2798_v63 }
 0x1c7   : > { %v2820_v0 = vpop.eup %2017  ;;  %2029 = vpow2.f32 %v1287_v14  ;;  %v1304_v18 = vadd.f32 %v2814_v12, %v2808_v61  ;;  %v821_v35 = vsel %vm2842_vm1, %v2709_v46, %v2772_v11  ;;  %v1269_v14 = vmul.f32 1.442695, %v1243_v41  ;;  %v2871_v11 = vpop.xlane.xlu1 %747 }
 0x1c8   : > { %v2827_v42 = vpop.eup %2019  ;;  %2031 = vpow2.f32 %v1253_v38  ;;  %v2852_v13 = vmul.f32 %v2820_v0, %v2769_v48  ;;  %v830_v60 = vmul.f32 %v2745_v3, %v829_v58  ;;  %vm823_vm4 = vcmp.eq.f32.partialorder %v822_v16, 8.507059e+37  ;;  %v2896_v41 = vpop.xlane.xlu2 %774 }
 0x1c9   : > { %v2832_v6 = vpop.eup %2021  ;;  %v1305_v62 = vadd.f32 %v2827_v42, %v1304_v18  ;;  %2033 = vpow2.f32 %v1255_v57  ;;  %v826_v46 = vsel %vm823_vm4, %v2755_v30, %v821_v35  ;;  %v942_v27 = vmul.f32 %v2774_v25, %v941_v24  ;;  %v2913_v34 = vpop.xlane.xlu0 %750 }
 0x1ca   : > { %v2835_v17 = vpop.eup %2023  ;;  %2035 = vpow2.f32 %v1283_v19  ;;  %v2868_v38 = vmul.f32 %v2832_v6, %v2786_v37  ;;  %v1039_v16 = vmul.f32 %v2513_v51, %v826_v46  ;;  %v955_v19 = vsub.f32 1.0, %v2852_v13 }
 0x1cb   : > { %v2846_v23 = vpop.eup %2025  ;;  %v1306_v32 = vadd.f32 %v2835_v17, %v1305_v62  ;;  %2037 = vpow2.f32 %v1257_v26  ;;  %v978_v30 = vand.u32 2147483648, %v2786_v37  ;;  %v831_v18 = vadd.f32 %v2745_v3, %v830_v60 }
 0x1cc   : > { %v2858_v63 = vpop.eup %2027  ;;  %2039 = vpow2.f32 %v1285_v47  ;;  %1927 = vmatmul.msk.f32.gmra.mxu2 %vm621_vm5, %v1039_v16  ;;  %v969_v47 = vsub.f32 1.0, %v2868_v38  ;;  %vm945_vm11 = vweird.f32 %v2774_v25  ;;  %v852_v35 = vand.u32 2147483648, %v2825_v54 }
 0x1cd   : > { %v2863_v31 = vpop.eup %2029  ;;  %v1307_v43 = vadd.f32 %v2846_v23, %v1306_v32  ;;  %2041 = vpow2.f32 %v1259_v22  ;;  %vm946_vm12 = vmor %vm944_vm3, %vm945_vm11  ;;  %vm958_vm13 = vweird.f32 %v2769_v48  ;;  %vm949_vm6 = vcmp.eq.f32.partialorder %v948_v50, 8.507059e+37 }
 0x1ce   : > { %v2873_v10 = vpop.eup %2031  ;;  %v1311_v58 = vsel %vm1210_vm8, %v2863_v31, 0.0  ;;  %2043 = vpow2.f32 %v1261_v28  ;;  %v835_v28 = vsel %vm834_vm9, %v2745_v3, %v831_v18  ;;  %vm846_vm14 = vweird.f32 %v2825_v54 }
 0x1cf   : > { %v2879_v49 = vpop.eup %2033  ;;  %v1308_v57 = vadd.f32 %v2858_v63, %v1307_v43  ;;  %2045 = vpow2.f32 %v1263_v55  ;;  %v943_v55 = vadd.f32 %v2774_v25, %v942_v27  ;;  %v840_v32 = vsel %vm837_vm10, %v2763_v40, %v835_v28 }
 0x1d0   : > { %v2884_v5 = vpop.eup %2035  ;;  %2047 = vpow2.f32 %v1269_v14  ;;  %v1289_v36 = vadd.f32 %v2879_v49, %v2873_v10  ;;  %v1040_v3 = vmul.f32 %v2538_v56, %v840_v32  ;;  %v2934_v56 = vor.u32 1.1754944e-38, %v964_v7 }
 0x1d1   : > { %v2891_v51 = vpop.eup %2037  ;;  %v1309_v26 = vadd.f32 %v2884_v5, %v1308_v57  ;;  %2049 = vrcp.f32 %v2825_v54  ;;  %v947_v14 = vsel %vm946_vm12, %v2774_v25, %v943_v55  ;;  %v2941_v25 = vpop.xlane.xlu1 %777  ;;  %v970_v7 = vmul.f32 %v2832_v6, %v969_v47 }
 0x1d2   : > { %v2902_v22 = vpop.eup %2039  ;;  %v1290_v62 = vadd.f32 %v2891_v51, %v1289_v36  ;;  %2051 = vrcp.f32 %v2871_v11  ;;  %v952_v38 = vsel %vm949_vm6, %v2767_v52, %v947_v14  ;;  %v2947_v16 = vor.u32 1.1754944e-38, %v978_v30 }
 0x1d3   : > { %v2908_v24 = vpop.eup %2041  ;;  %v1310_v44 = vadd.f32 %v2902_v22, %v1309_v26  ;;  %2053 = vpow2.f32 %v1265_v4  ;;  %v1048_v39 = vmul.f32 %v2534_v29, %v952_v38  ;;  %v853_v36 = vor.u32 1.1754944e-38, %v852_v35 }
 0x1d4   : > { %v2915_v20 = vpop.eup %2043  ;;  %v1291_v13 = vadd.f32 %v2908_v24, %v1290_v62  ;;  %2055 = vrcp.f32 %v2896_v41  ;;  %1928 = vmatmul.msk.f32.gmra.mxu2 %vm621_vm5, %v1040_v3  ;;  %vm860_vm15 = vweird.f32 %v2871_v11  ;;  %v850_v47 = vand.u32 2147483647, %v2825_v54 }
 0x1d5   : > { %v2923_v4 = vpop.eup %2045  ;;  %v1312_v40 = vadd.f32 %v1311_v58, %v1310_v44  ;;  %2057 = vpow2.f32 %v1267_v9  ;;  %v956_v58 = vmul.f32 %v2820_v0, %v955_v19  ;;  %1937 = vmatmul.msk.f32.gmra.mxu3 %vm621_vm5, %v1048_v39  ;;  %vm959_vm3 = vweird.f32 %v2820_v0 }
 0x1d6   : > { %v2929_v60 = vpop.eup %2047  ;;  %v1292_v43 = vadd.f32 %v2915_v20, %v1291_v13  ;;  %2059 = vrcp.f32 %v2913_v34  ;;  %vm972_vm4 = vweird.f32 %v2786_v37  ;;  %vm2980_vm7 = vmor %vm958_vm13, %vm959_vm3  ;;  %vm973_vm13 = vweird.f32 %v2832_v6 }
 0x1d7   : > { %v2050_v9 = vpop.eup %2049  ;;  %v1313_v46 = vrot.slane %v1312_v40, 4  ;;  %2061 = vrcp.f32 %v2941_v25  ;;  %v1296_v55 = vsel %vm1210_vm8, %v2929_v60, 0.0  ;;  %v957_v32 = vadd.f32 %v2820_v0, %v956_v58 }
 0x1d8   : > { %v2943_v50 = vpop.eup %2051  ;;  %v1293_v27 = vadd.f32 %v2923_v4, %v1292_v43  ;;  %v842_v52 = vmul.f32 %v2050_v9, %v2825_v54  ;;  %vm847_vm1 = vweird.f32 %v2050_v9  ;;  %v866_v58 = vand.u32 2147483648, %v2871_v11 }
 0x1d9   : > { %v2951_v57 = vpop.eup %2053  ;;  %v1314_v19 = vadd.f32 %v1313_v46, %v1312_v40  ;;  %v856_v29 = vmul.f32 %v2943_v50, %v2871_v11  ;;  %vm851_vm8 = vcmp.eq.f32.partialorder %v850_v47, 8.507059e+37  ;;  %vm848_vm9 = vmor %vm846_vm14, %vm847_vm1  ;;  %vm861_vm10 = vweird.f32 %v2943_v50 }
 0x1da   : > { %v2957_v18 = vpop.eup %2055  ;;  %v1294_v30 = vadd.f32 %v2951_v57, %v1293_v27  ;;  %v843_v26 = vsub.f32 1.0, %v842_v52  ;;  %vm3001_vm12 = vmor %vm860_vm15, %vm861_vm10  ;;  %vm874_vm1 = vweird.f32 %v2913_v34 }
 0x1db   : > { %v2962_v62 = vpop.eup %2057  ;;  %v1315_v28 = vrot.slane %v1314_v19, 2  ;;  %v857_v44 = vsub.f32 1.0, %v856_v29  ;;  %v982_v43 = vmul.f32 %v2957_v18, %v2896_v41  ;;  %v961_v29 = vsel %vm2980_vm7, %v2820_v0, %v957_v32  ;;  %vm974_vm14 = vmor %vm972_vm4, %vm973_vm13 }
 0x1dc   : > { %v2967_v13 = vpop.eup %2059  ;;  %v1295_v35 = vadd.f32 %v2962_v62, %v1294_v30  ;;  %v844_v3 = vmul.f32 %v2050_v9, %v843_v26  ;;  %v962_v30 = vand.u32 2147483647, %v2769_v48  ;;  %v867_v32 = vor.u32 1.1754944e-38, %v866_v58 }
 0x1dd   : > { %v1316_v40 = vadd.f32 %v1315_v28, %v1314_v19  ;;  %v858_v14 = vmul.f32 %v2943_v50, %v857_v44  ;;  %v870_v38 = vmul.f32 %v2967_v13, %v2913_v34  ;;  %v2990_v26 = vpop.eup %2061  ;;  %vm875_vm15 = vweird.f32 %v2967_v13 }
 0x1de   : > { %v1297_v46 = vadd.f32 %v1296_v55, %v1295_v35  ;;  %v845_v39 = vadd.f32 %v2050_v9, %v844_v3  ;;  %v983_v35 = vsub.f32 1.0, %v982_v43  ;;  %vm963_vm11 = vcmp.eq.f32.partialorder %v962_v30, 8.507059e+37  ;;  %vm3030_vm4 = vmor %vm874_vm1, %vm875_vm15 }
 0x1df   : > { %v1317_v52 = vrot.slane %v1316_v40, 1  ;;  %v871_v19 = vsub.f32 1.0, %v870_v38  ;;  %v859_v55 = vadd.f32 %v2943_v50, %v858_v14  ;;  %v966_v48 = vsel %vm963_vm11, %v2934_v56, %v961_v29 }
 0x1e0   : > { %v1298_v47 = vrot.slane %v1297_v46, 4  ;;  %v849_v28 = vsel %vm848_vm9, %v2050_v9, %v845_v39  ;;  %v864_v56 = vand.u32 2147483647, %v2871_v11  ;;  %v971_v43 = vadd.f32 %v2832_v6, %v970_v7 }
 0x1e1   : > { %v2994_v44 = vadd.f32 %v1317_v52, %v1316_v40  ;;  %v854_v3 = vsel %vm851_vm8, %v853_v36, %v849_v28  ;;  %v872_v38 = vmul.f32 %v2967_v13, %v871_v19  ;;  %v992_v40 = vand.u32 2147483648, %v2896_v41 }
 0x1e2   : > { %v1299_v54 = vadd.f32 %v1298_v47, %v1297_v46  ;;  %v1041_v0 = vmul.f32 %v2558_v33, %v854_v3  ;;  %v863_v36 = vsel %vm3001_vm12, %v2943_v50, %v859_v55  ;;  %v1049_v33 = vmul.f32 %v2554_v1, %v966_v48 }
 0x1e3   : > { %2063 = vrcp.f32 %v2994_v44  ;;  %v984_v46 = vmul.f32 %v2957_v18, %v983_v35  ;;  %v996_v58 = vmul.f32 %v2990_v26, %v2941_v25  ;;  %v976_v39 = vand.u32 2147483647, %v2786_v37 }
 0x1e4   : > { %v1300_v14 = vrot.slane %v1299_v54, 2  ;;  %1929 = vmatmul.msk.f32.gmra.mxu2 %vm621_vm5, %v1041_v0  ;;  %1938 = vmatmul.msk.f32.gmra.mxu3 %vm621_vm5, %v1049_v33  ;;  %vm865_vm6 = vcmp.eq.f32.partialorder %v864_v56, 8.507059e+37  ;;  %v873_v1 = vadd.f32 %v2967_v13, %v872_v38  ;;  %v880_v11 = vand.u32 2147483648, %v2913_v34 }
 0x1e5   : > { %v868_v50 = vsel %vm865_vm6, %v867_v32, %v863_v36  ;;  %v975_v7 = vsel %vm974_vm14, %v2832_v6, %v971_v43  ;;  %vm977_vm3 = vcmp.eq.f32.partialorder %v976_v39, 8.507059e+37  ;;  %v878_v29 = vand.u32 2147483647, %v2913_v34 }
 0x1e6   : > { %v1301_v27 = vadd.f32 %v1300_v14, %v1299_v54  ;;  %v1042_v19 = vmul.f32 %v2574_v15, %v868_v50  ;;  %v997_v37 = vsub.f32 1.0, %v996_v58  ;;  %v980_v47 = vsel %vm977_vm3, %v2947_v16, %v975_v7  ;;  %v3589_v7 = vld [vmem:[#allocation5_spill] sm:$0xff] }
 0x1e7   : > { %v985_v55 = vadd.f32 %v2957_v18, %v984_v46  ;;  %vm987_vm8 = vweird.f32 %v2957_v18  ;;  %v877_v15 = vsel %vm3030_vm4, %v2967_v13, %v873_v1  ;;  %vm986_vm7 = vweird.f32 %v2896_v41 }
 0x1e8   : > { %v1302_v52 = vrot.slane %v1301_v27, 1  ;;  %v881_v34 = vor.u32 1.1754944e-38, %v880_v11  ;;  %v990_v16 = vand.u32 2147483647, %v2896_v41  ;;  %v993_v54 = vor.u32 1.1754944e-38, %v992_v40  ;;  %vm988_vm10 = vmor %vm986_vm7, %vm987_vm8 }
 0x1e9   : > { %v2064_v30 = vpop.eup %2063  ;;  %v1050_v38 = vmul.f32 %v2552_v21, %v980_v47  ;;  %vm879_vm9 = vcmp.eq.f32.partialorder %v878_v29, 8.507059e+37  ;;  %v1344_v0 = vand.u32 2147483648, %v2994_v44  ;;  %v998_v48 = vmul.f32 %v2990_v26, %v997_v37 }
 0x1ea   : > { %v1334_v6 = vmul.f32 %v2064_v30, %v2994_v44  ;;  %v3037_v35 = vadd.f32 %v1302_v52, %v1301_v27  ;;  %v882_v9 = vsel %vm879_vm9, %v881_v34, %v877_v15  ;;  %v989_v13 = vsel %vm988_vm10, %v2957_v18, %v985_v55  ;;  %v3590_v52 = vld [vmem:[#allocation7_spill] sm:$0xff] }
 0x1eb   : > { %vm1339_vm11 = vweird.f32 %v2064_v30  ;;  %v1342_v36 = vand.u32 2147483647, %v2994_v44  ;;  %vm991_vm12 = vcmp.eq.f32.partialorder %v990_v16, 8.507059e+37  ;;  %vm1338_vm13 = vweird.f32 %v2994_v44 }
 0x1ec   : > { %v1335_v3 = vsub.f32 1.0, %v1334_v6  ;;  %1930 = vmatmul.msk.f32.gmra.mxu2 %vm621_vm5, %v1042_v19  ;;  %2065 = vrcp.f32 %v3037_v35  ;;  %1939 = vmatmul.msk.f32.gmra.mxu3 %vm621_vm5, %v1050_v38  ;;  %v1043_v21 = vmul.f32 %v2580_v59, %v882_v9  ;;  %v994_v40 = vsel %vm991_vm12, %v993_v54, %v989_v13  ;;  %vm1340_vm6 = vmor %vm1338_vm13, %vm1339_vm11  ;;  %v3592_v6 = vld [vmem:[#allocation11_spill] sm:$0xff]  ;;  %v3593_v54 = vld [vmem:[#allocation13_spill] sm:$0xff] }
 0x1ed   : > { %v1345_v14 = vor.u32 1.1754944e-38, %v1344_v0  ;;  %v999_v33 = vadd.f32 %v2990_v26, %v998_v48  ;;  %vm1001_vm14 = vweird.f32 %v2990_v26  ;;  %vm1343_vm15 = vcmp.eq.f32.partialorder %v1342_v36, 8.507059e+37  ;;  %v3594_v48 = vld [vmem:[#allocation20_spill] sm:$0xff] }
 0x1ee   : > { %v1336_v32 = vmul.f32 %v2064_v30, %v1335_v3  ;;  %vm1000_vm1 = vweird.f32 %v2941_v25  ;;  %v1006_v43 = vand.u32 2147483648, %v2941_v25  ;;  %v1051_v46 = vmul.f32 %v2572_v8, %v994_v40 }
 0x1ef   : > { %v1004_v44 = vand.u32 2147483647, %v2941_v25  ;;  %vm3065_vm3 = vmor %vm1000_vm1, %vm1001_vm14  ;;  %v3588_v25 = vld [vmem:[#allocation3_spill] sm:$0xff]  ;;  %v1330_v0 = vand.u32 2147483648, %v3037_v35  ;;  %v1328_v36 = vand.u32 2147483647, %v3037_v35  ;;  %vm1324_vm7 = vweird.f32 %v3037_v35 }
 0x1f0   : > { %v1337_v41 = vadd.f32 %v2064_v30, %v1336_v32 }
 0x1f1   : > { %vm1005_vm4 = vcmp.eq.f32.partialorder %v1004_v44, 8.507059e+37  ;;  %vm1329_vm10 = vcmp.eq.f32.partialorder %v1328_v36, 8.507059e+37 }
 0x1f2   : > { %v1341_v18 = vsel %vm1340_vm6, %v2064_v30, %v1337_v41  ;;  %v2066_v58 = vpop.eup %2065  ;;  %v1007_v30 = vor.u32 1.1754944e-38, %v1006_v43  ;;  %v1331_v43 = vor.u32 1.1754944e-38, %v1330_v0 }
 0x1f3   : > { %v1346_v56 = vsel %vm1343_vm15, %v1345_v14, %v1341_v18  ;;  %v1320_v29 = vmul.f32 %v2066_v58, %v3037_v35  ;;  %vm1325_vm8 = vweird.f32 %v2066_v58 }
 0x1f4   : > { %v1356_v59 = vmul.f32 %v2808_v61, %v1346_v56  ;;  %v1357_v39 = vmul.f32 %v2814_v12, %v1346_v56  ;;  %v1358_v27 = vmul.f32 %v2827_v42, %v1346_v56  ;;  %v1359_v1 = vmul.f32 %v2835_v17, %v1346_v56  ;;  %1931 = vmatmul.msk.f32.gmra.mxu2 %vm621_vm5, %v1043_v21  ;;  %vm1326_vm9 = vmor %vm1324_vm7, %vm1325_vm8 }
 0x1f5   : > { %v1360_v50 = vmul.f32 %v2846_v23, %v1346_v56  ;;  %v1363_v8 = vmul.f32 %v2902_v22, %v1346_v56  ;;  %v1003_v61 = vsel %vm3065_vm3, %v2990_v26, %v999_v33  ;;  %v1364_v12 = vmul.f32 %v2863_v31, %v1346_v56  ;;  %1940 = vmatmul.msk.f32.gmra.mxu3 %vm621_vm5, %v1051_v46  ;;  %v3591_v22 = vld [vmem:[#allocation9_spill] sm:$0xff] }
 0x1f6   : > { %v1374_v42 = vmul.f32 %v1356_v59, %v3588_v25  ;;  %v1375_v17 = vmul.f32 %v1357_v39, %v3589_v7  ;;  %v1376_v19 = vmul.f32 %v1358_v27, %v3590_v52  ;;  %v1361_v23 = vmul.f32 %v2858_v63, %v1346_v56  ;;  %v3596_v33 = vld [vmem:[#allocation17_spill] sm:$0xff]  ;;  %v3597_v59 = vld [vmem:[#allocation19_spill] sm:$0xff] }
 0x1f7   : > { %v1377_v37 = vmul.f32 %v1359_v1, %v3591_v22  ;;  %v1008_v28 = vsel %vm1005_vm4, %v1007_v30, %v1003_v61  ;;  %v1362_v55 = vmul.f32 %v2884_v5, %v1346_v56  ;;  %v1378_v15 = vmul.f32 %v1360_v50, %v3592_v6  ;;  %v3595_v5 = vld [vmem:[#allocation15_spill] sm:$0xff]  ;;  %v3599_v30 = vld [vmem:[#allocation4_spill] sm:$0xff] }
 0x1f8   : > { %v1406_v26 = vsel %vm306_vm0, %v1374_v42, 0.0  ;;  %v1407_v31 = vsel %vm306_vm0, %v1375_v17, 0.0  ;;  %v1409_v34 = vsel %vm306_vm0, %v1376_v19, 0.0  ;;  %v1321_v3 = vsub.f32 1.0, %v1320_v29  ;;  %v3598_v19 = vld [vmem:[#allocation2_spill] sm:$0xff] }
 0x1f9   : > { %v1408_v47 = vadd.f32 %v1407_v31, %v1406_v26  ;;  %v1379_v38 = vmul.f32 %v1361_v23, %v3593_v54  ;;  %v1411_v63 = vsel %vm306_vm0, %v1377_v37, 0.0  ;;  %v1052_v9 = vmul.f32 %v3594_v48, %v1008_v28  ;;  %v3600_v37 = vld [vmem:[#allocation6_spill] sm:$0xff]  ;;  %v3601_v31 = vld [vmem:[#allocation8_spill] sm:$0xff] }
 0x1fa   : > { %v1322_v32 = vmul.f32 %v2066_v58, %v1321_v3  ;;  %v1380_v41 = vmul.f32 %v1362_v55, %v3595_v5  ;;  %v1413_v21 = vsel %vm306_vm0, %v1378_v15, 0.0  ;;  %v1381_v18 = vmul.f32 %v1363_v8, %v3596_v33  ;;  %v3602_v15 = vld [vmem:[#allocation10_spill] sm:$0xff] }
 0x1fb   : > { %v1410_v16 = vadd.f32 %v1409_v34, %v1408_v47  ;;  %v1415_v56 = vsel %vm306_vm0, %v1379_v38, 0.0  ;;  %v1382_v39 = vmul.f32 %v1364_v12, %v3597_v59  ;;  %v3603_v38 = vld [vmem:[#allocation12_spill] sm:$0xff] }
 0x1fc   : > { %v1323_v14 = vadd.f32 %v2066_v58, %v1322_v32  ;;  %v1417_v27 = vsel %vm306_vm0, %v1380_v41, 0.0  ;;  %v1419_v8 = vsel %vm306_vm0, %v1381_v18, 0.0 }
 0x1fd   : > { %v1412_v13 = vadd.f32 %v1411_v63, %v1410_v16  ;;  %1941 = vmatmul.msk.f32.gmra.mxu3 %vm621_vm5, %v1052_v9  ;;  %v1421_v29 = vsel %vm331_vm2, %v1382_v39, 0.0  ;;  %v3604_v9 = vld [vmem:[#allocation14_spill] sm:$0xff] }
 0x1fe   : > { %v1327_v44 = vsel %vm1326_vm9, %v2066_v58, %v1323_v14  ;;  %v3606_v14 = vld [vmem:[#allocation18_spill] sm:$0xff] }
 0x1ff   : > { %v1414_v40 = vadd.f32 %v1413_v21, %v1412_v13  ;;  %v1332_v1 = vsel %vm1329_vm10, %v1331_v43, %v1327_v44 }
 0x200   : > { %v1347_v50 = vmul.f32 %v2873_v10, %v1332_v1  ;;  %v1348_v61 = vmul.f32 %v2879_v49, %v1332_v1  ;;  %v1349_v35 = vmul.f32 %v2891_v51, %v1332_v1  ;;  %v1350_v42 = vmul.f32 %v2908_v24, %v1332_v1 }
 0x201   : > { %v1416_v46 = vadd.f32 %v1415_v56, %v1414_v40  ;;  %v1351_v12 = vmul.f32 %v2915_v20, %v1332_v1  ;;  %v1352_v49 = vmul.f32 %v2923_v4, %v1332_v1  ;;  %v1353_v55 = vmul.f32 %v2951_v57, %v1332_v1  ;;  %v3605_v57 = vld [vmem:[#allocation16_spill] sm:$0xff] }
 0x202   : > { %v1365_v58 = vmul.f32 %v1347_v50, %v3598_v19  ;;  %v1366_v23 = vmul.f32 %v1348_v61, %v3599_v30  ;;  %v1367_v26 = vmul.f32 %v1349_v35, %v3600_v37  ;;  %v1368_v51 = vmul.f32 %v1350_v42, %v3601_v31 }
 0x203   : > { %v1418_v11 = vadd.f32 %v1417_v27, %v1416_v46  ;;  %v1369_v34 = vmul.f32 %v1351_v12, %v3602_v15  ;;  %v1354_v3 = vmul.f32 %v2962_v62, %v1332_v1  ;;  %v1370_v63 = vmul.f32 %v1352_v49, %v3603_v38 }
 0x204   : > { %v1383_v47 = vsel %vm306_vm0, %v1365_v58, 0.0  ;;  %v1384_v24 = vsel %vm306_vm0, %v1366_v23, 0.0  ;;  %v1386_v20 = vsel %vm306_vm0, %v1367_v26, 0.0  ;;  %v1388_v4 = vsel %vm306_vm0, %v1368_v51, 0.0 }
 0x205   : > { %v1420_v17 = vadd.f32 %v1419_v8, %v1418_v11  ;;  %v1385_v28 = vadd.f32 %v1384_v24, %v1383_v47  ;;  %v1355_v48 = vmul.f32 %v2929_v60, %v1332_v1  ;;  %v1371_v13 = vmul.f32 %v1353_v55, %v3604_v9 }
 0x206   : > { %v1390_v32 = vsel %vm306_vm0, %v1369_v34, 0.0  ;;  %v1372_v41 = vmul.f32 %v1354_v3, %v3605_v57  ;;  %v1392_v21 = vsel %vm306_vm0, %v1370_v63, 0.0 }
 0x207   : > { %v1422_v10 = vadd.f32 %v1421_v29, %v1420_v17  ;;  %v1387_v16 = vadd.f32 %v1386_v20, %v1385_v28  ;;  %v1373_v18 = vmul.f32 %v1355_v48, %v3606_v14  ;;  %v1394_v62 = vsel %vm306_vm0, %v1371_v13, 0.0  ;;  %v3607_v13 = vld [vmem:[#allocation21_spill] sm:$0xff] }
 0x208   : > { %v1396_v43 = vsel %vm306_vm0, %v1372_v41, 0.0 }
 0x209   : > { %v1389_v0 = vadd.f32 %v1388_v4, %v1387_v16  ;;  %v1398_v60 = vsel %vm331_vm2, %v1373_v18, 0.0  ;;  %v1423_v29 = vrot.slane %v1422_v10, 4 }
 0x20b   : > { %v1391_v36 = vadd.f32 %v1390_v32, %v1389_v0  ;;  %v1424_v28 = vadd.f32 %v1423_v29, %v1422_v10 }
 0x20d   : > { %v1393_v40 = vadd.f32 %v1392_v21, %v1391_v36  ;;  %v1425_v0 = vrot.slane %v1424_v28, 2 }
 0x20f   : > { %v1395_v56 = vadd.f32 %v1394_v62, %v1393_v40  ;;  %v1426_v62 = vadd.f32 %v1425_v0, %v1424_v28 }
 0x211   : > { %v1397_v46 = vadd.f32 %v1396_v43, %v1395_v56 }
 0x213   : > { %v1399_v44 = vadd.f32 %v1398_v60, %v1397_v46 }
 0x215   : > { %v1400_v27 = vrot.slane %v1399_v44, 4 }
 0x217   : > { %v1401_v1 = vadd.f32 %v1400_v27, %v1399_v44 }
 0x218   : > { %v754_v39 = vpop.xlane.xlu2 %753 }
 0x219   : > { %2067 = vrcp.f32 %v754_v39  ;;  %v1402_v11 = vrot.slane %v1401_v1, 2  ;;  %v894_v23 = vand.u32 2147483648, %v754_v39  ;;  %v892_v26 = vand.u32 2147483647, %v754_v39 }
 0x21a   : > { %vm888_vm2 = vweird.f32 %v754_v39 }
 0x21b   : > { %v1403_v61 = vadd.f32 %v1402_v11, %v1401_v1  ;;  %v895_v55 = vor.u32 1.1754944e-38, %v894_v23  ;;  %vm893_vm12 = vcmp.eq.f32.partialorder %v892_v26, 8.507059e+37  ;;  %v1427_v11 = vrot.slane %v1426_v62, 1 }
 0x21d   : > { %v1404_v8 = vrot.slane %v1403_v61, 1 }
 0x21f   : > { %v2068_v50 = vpop.eup %2067  ;;  %v1405_v58 = vadd.f32 %v1404_v8, %v1403_v61 }
 0x220   : > { %v884_v35 = vmul.f32 %v2068_v50, %v754_v39  ;;  %vm889_vm0 = vweird.f32 %v2068_v50 }
 0x221   : > { %v1690_v49 = vmul.f32 %v1405_v58, %v3599_v30  ;;  %v1689_v51 = vmul.f32 %v1405_v58, %v3598_v19  ;;  %v1691_v47 = vmul.f32 %v1405_v58, %v3600_v37  ;;  %vm890_vm11 = vmor %vm888_vm2, %vm889_vm0  ;;  %v1693_v10 = vmul.f32 %v1405_v58, %v3602_v15 }
 0x222   : > { %v885_v42 = vsub.f32 1.0, %v884_v35  ;;  %v781_v17 = vpop.xlane.xlu0 %780  ;;  %v1692_v36 = vmul.f32 %v1405_v58, %v3601_v31  ;;  %v1694_v21 = vmul.f32 %v1405_v58, %v3603_v38  ;;  %v1695_v8 = vmul.f32 %v1405_v58, %v3604_v9 }
 0x223   : > { %2069 = vrcp.f32 %v781_v17  ;;  %1727 = vrot.lane.b32.xlu2 %v1690_v49, %s2083_s14  ;;  %1725 = vrot.lane.b32.xlu0 %v1689_v51, %s2083_s14  ;;  %v1020_v41 = vand.u32 2147483648, %v781_v17  ;;  %v1018_v18 = vand.u32 2147483647, %v781_v17  ;;  %vm1014_vm6 = vweird.f32 %v781_v17 }
 0x224   : > { %v886_v12 = vmul.f32 %v2068_v50, %v885_v42  ;;  %1729 = vrot.lane.b32.xlu1 %v1691_v47, %s2083_s14  ;;  %v1697_v42 = vmul.f32 %v1405_v58, %v3606_v14  ;;  %v3157_v51 = vadd.f32 %v1427_v11, %v1426_v62  ;;  %vm1799_vm2 = vcmask 122880  }
 0x225   : > { %v1021_v46 = vor.u32 1.1754944e-38, %v1020_v41  ;;  %vm1019_vm15 = vcmp.eq.f32.partialorder %v1018_v18, 8.507059e+37 }
 0x226   : > { %v887_v24 = vadd.f32 %v2068_v50, %v886_v12  ;;  %v1698_v0 = vmul.f32 %v3157_v51, %v3588_v25 }
 0x228   : > { %v891_v20 = vsel %vm890_vm11, %v2068_v50, %v887_v24  ;;  %v1696_v50 = vmul.f32 %v1405_v58, %v3605_v57  ;;  %vm1651_vm11 = vcmask 359424  }
 0x229   : > { %v2070_v34 = vpop.eup %2069  ;;  %v3135_v63 = vpop.xlane.xlu2 %783  ;;  %v896_v4 = vsel %vm893_vm12, %v895_v55, %v891_v20  ;;  %vm1779_vm12 = vcmask 1047904  }
 0x22a   : > { %v1010_v16 = vmul.f32 %v2070_v34, %v781_v17  ;;  %v757_v3 = vpop.xlane.xlu1 %756  ;;  %v1044_v32 = vmul.f32 %v3607_v13, %v896_v4  ;;  %vm1015_vm13 = vweird.f32 %v2070_v34  ;;  %v1034_v23 = vand.u32 2147483648, %v3135_v63 }
 0x22b   : > { %2071 = vrcp.f32 %v757_v3  ;;  %1733 = vrot.lane.b32.xlu2 %v1693_v10, %s2083_s14  ;;  %1731 = vrot.lane.b32.xlu0 %v1692_v36, %s2083_s14  ;;  %vm1016_vm14 = vmor %vm1014_vm6, %vm1015_vm13  ;;  %v908_v17 = vand.u32 2147483648, %v757_v3  ;;  %v906_v26 = vand.u32 2147483647, %v757_v3  ;;  %vm902_vm4 = vweird.f32 %v757_v3 }
 0x22c   : > { %v1011_v48 = vsub.f32 1.0, %v1010_v16  ;;  %2073 = vrcp.f32 %v3135_v63  ;;  %1932 = vmatmul.msk.f32.gmra.mxu2 %vm621_vm5, %v1044_v32  ;;  %1735 = vrot.lane.b32.xlu1 %v1694_v21, %s2083_s14  ;;  %vm1028_vm8 = vweird.f32 %v3135_v63  ;;  %v1035_v28 = vor.u32 1.1754944e-38, %v1034_v23 }
 0x22d   : > { %v909_v47 = vor.u32 1.1754944e-38, %v908_v17  ;;  %vm907_vm9 = vcmp.eq.f32.partialorder %v906_v26, 8.507059e+37  ;;  %v1702_v32 = vmul.f32 %v3157_v51, %v3592_v6  ;;  %v1703_v10 = vmul.f32 %v3157_v51, %v3593_v54 }
 0x22e   : > { %v1012_v40 = vmul.f32 %v2070_v34, %v1011_v48  ;;  %v1700_v48 = vmul.f32 %v3157_v51, %v3590_v52  ;;  %vm1519_vm13 = vcmask 1048352   ;;  %vm1521_vm6 = vcmask 588800  }
 0x230   : > { %v1013_v56 = vadd.f32 %v2070_v34, %v1012_v40 }
 0x231   : > { %v2072_v43 = vpop.eup %2071 }
 0x232   : > { %v2074_v60 = vpop.eup %2073  ;;  %v898_v44 = vmul.f32 %v2072_v43, %v757_v3  ;;  %v1017_v39 = vsel %vm1016_vm14, %v2070_v34, %v1013_v56  ;;  %vm903_vm1 = vweird.f32 %v2072_v43  ;;  %v1699_v3 = vmul.f32 %v3157_v51, %v3589_v7  ;;  %v1177_v13 = vpop.f32.mrf.mxu3 }
 0x233   : > { %v1024_v27 = vmul.f32 %v2074_v60, %v3135_v63  ;;  %v1022_v1 = vsel %vm1019_vm15, %v1021_v46, %v1017_v39  ;;  %1739 = vrot.lane.b32.xlu2 %v1696_v50, %s2083_s14  ;;  %1737 = vrot.lane.b32.xlu0 %v1695_v8, %s2083_s14  ;;  %vm1029_vm3 = vweird.f32 %v2074_v60  ;;  %vm904_vm7 = vmor %vm902_vm4, %vm903_vm1  ;;  %v1568_v46 = vmul.f32 %v1177_v13, %v3588_v25 }
 0x234   : > { %v899_v61 = vsub.f32 1.0, %v898_v44  ;;  %v1053_v35 = vmul.f32 %v2700_v53, %v1022_v1  ;;  %v1032_v53 = vand.u32 2147483647, %v3135_v63  ;;  %1741 = vrot.lane.b32.xlu1 %v1697_v42, %s2083_s14  ;;  %vm1030_vm10 = vmor %vm1028_vm8, %vm1029_vm3  ;;  %vm1649_vm14 = vcmask 1048128  }
 0x235   : > { %v1025_v29 = vsub.f32 1.0, %v1024_v27  ;;  %vm1537_vm15 = vcmask 1041184   ;;  %vm1539_vm1 = vcmask 581632   ;;  %vm1667_vm3 = vcmask 1040960  }
 0x236   : > { %v900_v12 = vmul.f32 %v2072_v43, %v899_v61  ;;  %1942 = vmatmul.msk.f32.gmra.mxu3 %vm621_vm5, %v1053_v35  ;;  %vm1033_vm0 = vcmp.eq.f32.partialorder %v1032_v53, 8.507059e+37  ;;  %vm1669_vm4 = vcmask 352256   ;;  %vm1797_vm8 = vcmask 1040736  }
 0x237   : > { %v1026_v49 = vmul.f32 %v2074_v60, %v1025_v29 }
 0x238   : > { %v901_v58 = vadd.f32 %v2072_v43, %v900_v12 }
 0x239   : > { %v1027_v24 = vadd.f32 %v2074_v60, %v1026_v49  ;;  %v1704_v49 = vmul.f32 %v3157_v51, %v3595_v5 }
 0x23a   : > { %v905_v55 = vsel %vm904_vm7, %v2072_v43, %v901_v58  ;;  %v1180_v41 = vpop.f32.mrf.mxu3 }
 0x23b   : > { %v910_v34 = vsel %vm907_vm9, %v909_v47, %v905_v55  ;;  %v1031_v20 = vsel %vm1030_vm10, %v2074_v60, %v1027_v24  ;;  %1745 = vrot.lane.b32.xlu2 %v1699_v3, %s2083_s14  ;;  %1743 = vrot.lane.b32.xlu0 %v1698_v0, %s2083_s14  ;;  %v1569_v56 = vmul.f32 %v1180_v41, %v3589_v7 }
 0x23c   : > { %v1045_v16 = vmul.f32 %v2728_v2, %v910_v34  ;;  %v1036_v4 = vsel %vm1033_vm0, %v1035_v28, %v1031_v20  ;;  %1747 = vrot.lane.b32.xlu1 %v1700_v48, %s2083_s14  ;;  %v1103_v2 = vpop.f32.mrf.mxu2 }
 0x23d   : > { %v1054_v63 = vmul.f32 %v2724_v45, %v1036_v4  ;;  %v1701_v45 = vmul.f32 %v3157_v51, %v3591_v22  ;;  %v1559_v62 = vmul.f32 %v1103_v2, %v3598_v19 }
 0x23e   : > { %1933 = vmatmul.msk.f32.gmra.mxu2 %vm621_vm5, %v1045_v16 }
 0x23f   : > { %1943 = vmatmul.msk.f32.gmra.mxu3 %vm621_vm5, %v1054_v63  ;;  %vm1781_vm5 = vcmask 130048  }
 0x243   : > { %1751 = vrot.lane.b32.xlu2 %v1702_v32, %s2083_s14  ;;  %1749 = vrot.lane.b32.xlu0 %v1701_v45, %s2083_s14 }
 0x244   : > { %1753 = vrot.lane.b32.xlu1 %v1703_v10, %s2083_s14  ;;  %v1106_v36 = vpop.f32.mrf.mxu2 }
 0x245   : > { %v1560_v21 = vmul.f32 %v1106_v36, %v3599_v30 }
 0x24b   : > { %1485 = vrot.lane.b32.xlu2 %v1180_v41, %s2084_s15  ;;  %1465 = vrot.lane.b32.xlu0 %v1103_v2, %s2084_s15 }
 0x24c   : > { %1467 = vrot.lane.b32.xlu1 %v1106_v36, %s2084_s15  ;;  %v1705_v36 = vmul.f32 %v3157_v51, %v3596_v33 }
 0x24f   : > { %v1109_v40 = vpop.f32.mrf.mxu2 }
 0x250   : > { %v1561_v30 = vmul.f32 %v1109_v40, %v3600_v37 }
 0x253   : > { %1597 = vrot.lane.b32.xlu2 %v1560_v21, %s2085_s16  ;;  %1483 = vrot.lane.b32.xlu0 %v1177_v13, %s2084_s15 }
 0x257   : > { %v1112_v43 = vpop.f32.mrf.mxu2 }
 0x258   : > { %v1183_v18 = vpop.f32.mrf.mxu3  ;;  %v1562_v39 = vmul.f32 %v1112_v43, %v3601_v31 }
 0x259   : > { %1487 = vrot.lane.b32.xlu1 %v1183_v18, %s2084_s15  ;;  %v1570_v7 = vmul.f32 %v1183_v18, %v3590_v52 }
 0x25b   : > { %1615 = vrot.lane.b32.xlu2 %v1569_v56, %s2085_s16  ;;  %1595 = vrot.lane.b32.xlu0 %v1559_v62, %s2085_s16  ;;  %v1706_v62 = vmul.f32 %v3157_v51, %v3597_v59 }
 0x261   : > { %1599 = vrot.lane.b32.xlu1 %v1561_v30, %s2085_s16 }
 0x263   : > { %1469 = vrot.lane.b32.xlu2 %v1109_v40, %s2084_s15  ;;  %1613 = vrot.lane.b32.xlu0 %v1568_v46, %s2085_s16 }
 0x267   : > { %v1186_v19 = vpop.f32.mrf.mxu3  ;;  %v1115_v60 = vpop.f32.mrf.mxu2 }
 0x268   : > { %v1563_v52 = vmul.f32 %v1115_v60, %v3602_v15  ;;  %v1571_v11 = vmul.f32 %v1186_v19, %v3591_v22 }
 0x269   : > { %1617 = vrot.lane.b32.xlu1 %v1570_v7, %s2085_s16 }
 0x26b   : > { %1471 = vrot.lane.b32.xlu0 %v1112_v43, %s2084_s15  ;;  %1473 = vrot.lane.b32.xlu2 %v1115_v60, %s2084_s15 }
 0x26f   : > { %v1189_v37 = vpop.f32.mrf.mxu3  ;;  %v1118_v44 = vpop.f32.mrf.mxu2 }
 0x270   : > { %v1564_v1 = vmul.f32 %v1118_v44, %v3603_v38  ;;  %v1572_v50 = vmul.f32 %v1189_v37, %v3592_v6 }
 0x271   : > { %1475 = vrot.lane.b32.xlu1 %v1118_v44, %s2084_s15 }
 0x273   : > { %1489 = vrot.lane.b32.xlu0 %v1186_v19, %s2084_s15  ;;  %1491 = vrot.lane.b32.xlu2 %v1189_v37, %s2084_s15 }
 0x277   : > { %v1121_v22 = vpop.f32.mrf.mxu2 }
 0x278   : > { %v1192_v25 = vpop.f32.mrf.mxu3  ;;  %v1565_v8 = vmul.f32 %v1121_v22, %v3604_v9 }
 0x279   : > { %1493 = vrot.lane.b32.xlu1 %v1192_v25, %s2084_s15  ;;  %v1573_v15 = vmul.f32 %v1192_v25, %v3593_v54 }
 0x27b   : > { %1601 = vrot.lane.b32.xlu0 %v1562_v39, %s2085_s16  ;;  %1603 = vrot.lane.b32.xlu2 %v1563_v52, %s2085_s16 }
 0x27d   : > { %v1728_v27 = vpop.permute.xlu2 %1727 }
 0x27e   : > { %1784 = vst.msk [vmem:[%s2144_s11 + $0x38] sm:$0xff] %vm1781_vm5, %v1728_v27 }
 0x280   : > { %v1195_v38 = vpop.f32.mrf.mxu3 }
 0x281   : > { %1605 = vrot.lane.b32.xlu1 %v1564_v1, %s2085_s16  ;;  %v1574_v9 = vmul.f32 %v1195_v38, %v3595_v5 }
 0x283   : > { %1619 = vrot.lane.b32.xlu0 %v1571_v11, %s2085_s16  ;;  %1621 = vrot.lane.b32.xlu2 %v1572_v50, %s2085_s16 }
 0x285   : > { %v3218_v31 = vpop.permute.xlu2 %1733 }
 0x286   : > { %1790 = vst.msk [vmem:[%s2144_s11 + $0x98] sm:$0xff] %vm1781_vm5, %v3218_v31 }
 0x289   : > { %1623 = vrot.lane.b32.xlu1 %v1573_v15, %s2085_s16 }
 0x28b   : > { %1477 = vrot.lane.b32.xlu0 %v1121_v22, %s2084_s15 }
 0x28d   : > { %v3226_v6 = vpop.permute.xlu2 %1739 }
 0x28e   : > { %1796 = vst.msk [vmem:[%s2144_s11 + $0xf8] sm:$0xff] %vm1781_vm5, %v3226_v6 }
 0x293   : > { %1495 = vrot.lane.b32.xlu0 %v1195_v38, %s2084_s15 }
 0x295   : > { %v3232_v61 = vpop.permute.xlu0 %1725  ;;  %v1746_v35 = vpop.permute.xlu2 %1745 }
 0x296   : > { %1782 = vst.msk [vmem:[%s2144_s11 + $0x18] sm:$0xff] %vm1781_vm5, %v3232_v61  ;;  %v3237_v54 = vpop.permute.xlu1 %1729 }
 0x297   : > { %1786 = vst.msk [vmem:[%s2144_s11 + $0x58] sm:$0xff] %vm1781_vm5, %v3237_v54 }
 0x298   : > { %1804 = vst.msk [vmem:[%s2144_s11 + $0x158] sm:$0xff] %vm1781_vm5, %v1746_v35 }
 0x29b   : > { %1607 = vrot.lane.b32.xlu0 %v1565_v8, %s2085_s16 }
 0x29d   : > { %v3246_v42 = vpop.permute.xlu0 %1731  ;;  %v3248_v17 = vpop.permute.xlu2 %1751 }
 0x29e   : > { %1788 = vst.msk [vmem:[%s2144_s11 + $0x78] sm:$0xff] %vm1781_vm5, %v3246_v42  ;;  %v3253_v29 = vpop.permute.xlu1 %1735 }
 0x29f   : > { %1792 = vst.msk [vmem:[%s2144_s11 + $0xb8] sm:$0xff] %vm1781_vm5, %v3253_v29 }
 0x2a0   : > { %1810 = vst.msk [vmem:[%s2144_s11 + $0x1b8] sm:$0xff] %vm1781_vm5, %v3248_v17 }
 0x2a3   : > { %1625 = vrot.lane.b32.xlu0 %v1574_v9, %s2085_s16 }
 0x2a5   : > { %v3263_v12 = vpop.permute.xlu0 %1737  ;;  %v1486_v23 = vpop.permute.xlu2 %1485 }
 0x2a6   : > { %1794 = vst.msk [vmem:[%s2144_s11 + $0xd8] sm:$0xff] %vm1781_vm5, %v3263_v12  ;;  %v3268_v26 = vpop.permute.xlu1 %1741 }
 0x2a7   : > { %1800 = vst.msk [vmem:[%s2144_s11 + $0x118] sm:$0x1] %vm1799_vm2, %v3268_v26 }
 0x2a8   : > { %1543 = vst.msk [vmem:[%s2144_s11 + $0x140] sm:$0xff] %vm1519_vm13, %v1486_v23 }
 0x2a9   : > { %1544 = vst.msk [vmem:[%s2144_s11 + $0x148] sm:$0xff] %vm1521_vm6, %v1486_v23 }
 0x2ab   : > { %1755 = vrot.lane.b32.xlu0 %v1704_v49, %s2083_s14 }
 0x2ad   : > { %v3276_v53 = vpop.permute.xlu0 %1743  ;;  %v1598_v58 = vpop.permute.xlu2 %1597 }
 0x2ae   : > { %1802 = vst.msk [vmem:[%s2144_s11 + $0x138] sm:$0xff] %vm1781_vm5, %v3276_v53  ;;  %v3281_v47 = vpop.permute.xlu1 %1747 }
 0x2af   : > { %v1124_v24 = vpop.f32.mrf.mxu2  ;;  %1806 = vst.msk [vmem:[%s2144_s11 + $0x178] sm:$0xff] %vm1781_vm5, %v3281_v47 }
 0x2b0   : > { %1479 = vrot.lane.b32.xlu2 %v1124_v24, %s2084_s15  ;;  %1654 = vst.msk [vmem:[%s2144_s11 + $0x30] sm:$0xff] %vm1651_vm11, %v1598_v58  ;;  %v1566_v16 = vmul.f32 %v1124_v24, %v3605_v57 }
 0x2b1   : > { %1783 = vst.msk [vmem:[%s2144_s11 + $0x30] sm:$0xff] %vm1779_vm12, %v1728_v27 }
 0x2b5   : > { %v3289_v5 = vpop.permute.xlu0 %1749  ;;  %v1616_v28 = vpop.permute.xlu2 %1615 }
 0x2b6   : > { %1808 = vst.msk [vmem:[%s2144_s11 + $0x198] sm:$0xff] %vm1781_vm5, %v3289_v5  ;;  %v3294_v55 = vpop.permute.xlu1 %1753 }
 0x2b7   : > { %1812 = vst.msk [vmem:[%s2144_s11 + $0x1d8] sm:$0xff] %vm1781_vm5, %v3294_v55 }
 0x2b8   : > { %1674 = vst.msk [vmem:[%s2144_s11 + $0x150] sm:$0xff] %vm1651_vm11, %v1616_v28 }
 0x2b9   : > { %v1198_v34 = vpop.f32.mrf.mxu3  ;;  %1803 = vst.msk [vmem:[%s2144_s11 + $0x150] sm:$0xff] %vm1779_vm12, %v1746_v35 }
 0x2ba   : > { %1497 = vrot.lane.b32.xlu2 %v1198_v34, %s2084_s15  ;;  %1673 = vst.msk [vmem:[%s2144_s11 + $0x148] sm:$0xff] %vm1649_vm14, %v1616_v28  ;;  %v1575_v63 = vmul.f32 %v1198_v34, %v3596_v33 }
 0x2bd   : > { %v1466_v20 = vpop.permute.xlu0 %1465  ;;  %v1470_v4 = vpop.permute.xlu2 %1469 }
 0x2be   : > { %1520 = vst.msk [vmem:[%s2144_s11] sm:$0xff] %vm1519_vm13, %v1466_v20  ;;  %v1468_v3 = vpop.permute.xlu1 %1467 }
 0x2bf   : > { %1522 = vst.msk [vmem:[%s2144_s11 + $0x8] sm:$0xff] %vm1521_vm6, %v1466_v20 }
 0x2c0   : > { %1523 = vst.msk [vmem:[%s2144_s11 + $0x20] sm:$0xff] %vm1519_vm13, %v1468_v3 }
 0x2c1   : > { %v1127_v0 = vpop.f32.mrf.mxu2  ;;  %1524 = vst.msk [vmem:[%s2144_s11 + $0x28] sm:$0xff] %vm1521_vm6, %v1468_v3 }
 0x2c2   : > { %1609 = vrot.lane.b32.xlu2 %v1566_v16, %s2085_s16  ;;  %1481 = vrot.lane.b32.xlu1 %v1127_v0, %s2084_s15  ;;  %1653 = vst.msk [vmem:[%s2144_s11 + $0x28] sm:$0xff] %vm1649_vm14, %v1598_v58  ;;  %v1201_v2 = vpop.f32.mrf.mxu3  ;;  %v1567_v45 = vmul.f32 %v1127_v0, %v3606_v14 }
 0x2c3   : > { %1525 = vst.msk [vmem:[%s2144_s11 + $0x40] sm:$0xff] %vm1519_vm13, %v1470_v4  ;;  %v1576_v33 = vmul.f32 %v1201_v2, %v3597_v59 }
 0x2c4   : > { %1526 = vst.msk [vmem:[%s2144_s11 + $0x48] sm:$0xff] %vm1521_vm6, %v1470_v4 }
 0x2c5   : > { %v1484_v57 = vpop.permute.xlu0 %1483  ;;  %v1474_v48 = vpop.permute.xlu2 %1473 }
 0x2c6   : > { %1541 = vst.msk [vmem:[%s2144_s11 + $0x120] sm:$0xff] %vm1519_vm13, %v1484_v57 }
 0x2c7   : > { %1542 = vst.msk [vmem:[%s2144_s11 + $0x128] sm:$0xff] %vm1521_vm6, %v1484_v57 }
 0x2c8   : > { %1529 = vst.msk [vmem:[%s2144_s11 + $0x80] sm:$0xff] %vm1519_vm13, %v1474_v48 }
 0x2c9   : > { %1530 = vst.msk [vmem:[%s2144_s11 + $0x88] sm:$0xff] %vm1521_vm6, %v1474_v48 }
 0x2ca   : > { %1627 = vrot.lane.b32.xlu2 %v1575_v63, %s2085_s16  ;;  %1499 = vrot.lane.b32.xlu1 %v1201_v2, %s2084_s15 }
 0x2cb   : > { %v1488_v13 = vpop.permute.xlu1 %1487 }
 0x2cc   : > { %1545 = vst.msk [vmem:[%s2144_s11 + $0x160] sm:$0xff] %vm1519_vm13, %v1488_v13 }
 0x2cd   : > { %1546 = vst.msk [vmem:[%s2144_s11 + $0x168] sm:$0xff] %vm1521_vm6, %v1488_v13  ;;  %v1596_v32 = vpop.permute.xlu0 %1595  ;;  %v1492_v10 = vpop.permute.xlu2 %1491 }
 0x2ce   : > { %1650 = vst.msk [vmem:[%s2144_s11 + $0x8] sm:$0xff] %vm1649_vm14, %v1596_v32 }
 0x2cf   : > { %1652 = vst.msk [vmem:[%s2144_s11 + $0x10] sm:$0xff] %vm1651_vm11, %v1596_v32 }
 0x2d0   : > { %1549 = vst.msk [vmem:[%s2144_s11 + $0x1a0] sm:$0xff] %vm1519_vm13, %v1492_v10 }
 0x2d1   : > { %1550 = vst.msk [vmem:[%s2144_s11 + $0x1a8] sm:$0xff] %vm1521_vm6, %v1492_v10 }
 0x2d2   : > { %1757 = vrot.lane.b32.xlu2 %v1705_v36, %s2083_s14  ;;  %1611 = vrot.lane.b32.xlu1 %v1567_v45, %s2085_s16  ;;  %1780 = vst.msk [vmem:[%s2144_s11 + $0x10] sm:$0xff] %vm1779_vm12, %v3232_v61 }
 0x2d3   : > { %v1600_v14 = vpop.permute.xlu1 %1599 }
 0x2d4   : > { %1655 = vst.msk [vmem:[%s2144_s11 + $0x48] sm:$0xff] %vm1649_vm14, %v1600_v14 }
 0x2d5   : > { %1656 = vst.msk [vmem:[%s2144_s11 + $0x50] sm:$0xff] %vm1651_vm11, %v1600_v14  ;;  %v1614_v41 = vpop.permute.xlu0 %1613  ;;  %v1604_v21 = vpop.permute.xlu2 %1603 }
 0x2d6   : > { %1671 = vst.msk [vmem:[%s2144_s11 + $0x128] sm:$0xff] %vm1649_vm14, %v1614_v41 }
 0x2d7   : > { %1672 = vst.msk [vmem:[%s2144_s11 + $0x130] sm:$0xff] %vm1651_vm11, %v1614_v41 }
 0x2d8   : > { %1801 = vst.msk [vmem:[%s2144_s11 + $0x130] sm:$0xff] %vm1779_vm12, %v3276_v53 }
 0x2d9   : > { %1659 = vst.msk [vmem:[%s2144_s11 + $0x88] sm:$0xff] %vm1649_vm14, %v1604_v21 }
 0x2da   : > { %1629 = vrot.lane.b32.xlu1 %v1576_v33, %s2085_s16  ;;  %1660 = vst.msk [vmem:[%s2144_s11 + $0x90] sm:$0xff] %vm1651_vm11, %v1604_v21 }
 0x2db   : > { %v1618_v40 = vpop.permute.xlu1 %1617  ;;  %1785 = vst.msk [vmem:[%s2144_s11 + $0x50] sm:$0xff] %vm1779_vm12, %v3237_v54 }
 0x2dc   : > { %1675 = vst.msk [vmem:[%s2144_s11 + $0x168] sm:$0xff] %vm1649_vm14, %v1618_v40 }
 0x2dd   : > { %1676 = vst.msk [vmem:[%s2144_s11 + $0x170] sm:$0xff] %vm1651_vm11, %v1618_v40  ;;  %v1472_v18 = vpop.permute.xlu0 %1471  ;;  %v1622_v56 = vpop.permute.xlu2 %1621 }
 0x2de   : > { %1805 = vst.msk [vmem:[%s2144_s11 + $0x170] sm:$0xff] %vm1779_vm12, %v3281_v47 }
 0x2df   : > { %1527 = vst.msk [vmem:[%s2144_s11 + $0x60] sm:$0xff] %vm1519_vm13, %v1472_v18 }
 0x2e0   : > { %1528 = vst.msk [vmem:[%s2144_s11 + $0x68] sm:$0xff] %vm1521_vm6, %v1472_v18 }
 0x2e1   : > { %1679 = vst.msk [vmem:[%s2144_s11 + $0x1a8] sm:$0xff] %vm1649_vm14, %v1622_v56 }
 0x2e2   : > { %1759 = vrot.lane.b32.xlu1 %v1706_v62, %s2083_s14  ;;  %1680 = vst.msk [vmem:[%s2144_s11 + $0x1b0] sm:$0xff] %vm1651_vm11, %v1622_v56 }
 0x2e3   : > { %v1476_v59 = vpop.permute.xlu1 %1475  ;;  %1789 = vst.msk [vmem:[%s2144_s11 + $0x90] sm:$0xff] %vm1779_vm12, %v3218_v31 }
 0x2e4   : > { %1809 = vst.msk [vmem:[%s2144_s11 + $0x1b0] sm:$0xff] %vm1779_vm12, %v3248_v17 }
 0x2e5   : > { %v1490_v51 = vpop.permute.xlu0 %1489  ;;  %1531 = vst.msk [vmem:[%s2144_s11 + $0xa0] sm:$0xff] %vm1519_vm13, %v1476_v59 }
 0x2e6   : > { %1532 = vst.msk [vmem:[%s2144_s11 + $0xa8] sm:$0xff] %vm1521_vm6, %v1476_v59 }
 0x2e7   : > { %1547 = vst.msk [vmem:[%s2144_s11 + $0x180] sm:$0xff] %vm1519_vm13, %v1490_v51 }
 0x2e8   : > { %1548 = vst.msk [vmem:[%s2144_s11 + $0x188] sm:$0xff] %vm1521_vm6, %v1490_v51 }
 0x2eb   : > { %v1494_v43 = vpop.permute.xlu1 %1493 }
 0x2ec   : > { %1551 = vst.msk [vmem:[%s2144_s11 + $0x1c0] sm:$0xff] %vm1519_vm13, %v1494_v43 }
 0x2ed   : > { %1552 = vst.msk [vmem:[%s2144_s11 + $0x1c8] sm:$0xff] %vm1521_vm6, %v1494_v43  ;;  %v1602_v30 = vpop.permute.xlu0 %1601 }
 0x2ee   : > { %1657 = vst.msk [vmem:[%s2144_s11 + $0x68] sm:$0xff] %vm1649_vm14, %v1602_v30 }
 0x2ef   : > { %1658 = vst.msk [vmem:[%s2144_s11 + $0x70] sm:$0xff] %vm1651_vm11, %v1602_v30 }
 0x2f0   : > { %1787 = vst.msk [vmem:[%s2144_s11 + $0x70] sm:$0xff] %vm1779_vm12, %v3246_v42 }
 0x2f3   : > { %v1606_v46 = vpop.permute.xlu1 %1605 }
 0x2f4   : > { %1661 = vst.msk [vmem:[%s2144_s11 + $0xa8] sm:$0xff] %vm1649_vm14, %v1606_v46 }
 0x2f5   : > { %1662 = vst.msk [vmem:[%s2144_s11 + $0xb0] sm:$0xff] %vm1651_vm11, %v1606_v46  ;;  %v1620_v19 = vpop.permute.xlu0 %1619 }
 0x2f6   : > { %1677 = vst.msk [vmem:[%s2144_s11 + $0x188] sm:$0xff] %vm1649_vm14, %v1620_v19 }
 0x2f7   : > { %1678 = vst.msk [vmem:[%s2144_s11 + $0x190] sm:$0xff] %vm1651_vm11, %v1620_v19 }
 0x2f8   : > { %1807 = vst.msk [vmem:[%s2144_s11 + $0x190] sm:$0xff] %vm1779_vm12, %v3289_v5 }
 0x2f9   : > { %1791 = vst.msk [vmem:[%s2144_s11 + $0xb0] sm:$0xff] %vm1779_vm12, %v3253_v29 }
 0x2fb   : > { %v1624_v60 = vpop.permute.xlu1 %1623 }
 0x2fc   : > { %1681 = vst.msk [vmem:[%s2144_s11 + $0x1c8] sm:$0xff] %vm1649_vm14, %v1624_v60 }
 0x2fd   : > { %1682 = vst.msk [vmem:[%s2144_s11 + $0x1d0] sm:$0xff] %vm1651_vm11, %v1624_v60  ;;  %v1478_v7 = vpop.permute.xlu0 %1477 }
 0x2fe   : > { %1811 = vst.msk [vmem:[%s2144_s11 + $0x1d0] sm:$0xff] %vm1779_vm12, %v3294_v55 }
 0x2ff   : > { %1533 = vst.msk [vmem:[%s2144_s11 + $0xc0] sm:$0xff] %vm1519_vm13, %v1478_v7 }
 0x300   : > { %1534 = vst.msk [vmem:[%s2144_s11 + $0xc8] sm:$0xff] %vm1521_vm6, %v1478_v7 }
 0x305   : > { %v1496_v37 = vpop.permute.xlu0 %1495 }
 0x306   : > { %1553 = vst.msk [vmem:[%s2144_s11 + $0x1e0] sm:$0xff] %vm1519_vm13, %v1496_v37 }
 0x307   : > { %1554 = vst.msk [vmem:[%s2144_s11 + $0x1e8] sm:$0xff] %vm1521_vm6, %v1496_v37 }
 0x30a   : > { %v1480_v44 = vpop.permute.xlu2 %1479 }
 0x30b   : > { %1535 = vst.msk [vmem:[%s2144_s11 + $0xe0] sm:$0xff] %vm1519_vm13, %v1480_v44 }
 0x30c   : > { %1536 = vst.msk [vmem:[%s2144_s11 + $0xe8] sm:$0xff] %vm1521_vm6, %v1480_v44 }
 0x30d   : > { %v1608_v25 = vpop.permute.xlu0 %1607 }
 0x30e   : > { %1663 = vst.msk [vmem:[%s2144_s11 + $0xc8] sm:$0xff] %vm1649_vm14, %v1608_v25 }
 0x30f   : > { %1664 = vst.msk [vmem:[%s2144_s11 + $0xd0] sm:$0xff] %vm1651_vm11, %v1608_v25 }
 0x310   : > { %1793 = vst.msk [vmem:[%s2144_s11 + $0xd0] sm:$0xff] %vm1779_vm12, %v3263_v12 }
 0x314   : > { %v1498_v39 = vpop.permute.xlu2 %1497 }
 0x315   : > { %1555 = vst.msk [vmem:[%s2144_s11 + $0x200] sm:$0xff] %vm1519_vm13, %v1498_v39  ;;  %v1626_v52 = vpop.permute.xlu0 %1625 }
 0x316   : > { %1556 = vst.msk [vmem:[%s2144_s11 + $0x208] sm:$0xff] %vm1521_vm6, %v1498_v39 }
 0x317   : > { %1683 = vst.msk [vmem:[%s2144_s11 + $0x1e8] sm:$0xff] %vm1649_vm14, %v1626_v52 }
 0x318   : > { %1684 = vst.msk [vmem:[%s2144_s11 + $0x1f0] sm:$0xff] %vm1651_vm11, %v1626_v52 }
 0x31c   : > { %v1610_v27 = vpop.permute.xlu2 %1609 }
 0x31d   : > { %1665 = vst.msk [vmem:[%s2144_s11 + $0xe8] sm:$0xff] %vm1649_vm14, %v1610_v27  ;;  %v1756_v1 = vpop.permute.xlu0 %1755 }
 0x31e   : > { %1666 = vst.msk [vmem:[%s2144_s11 + $0xf0] sm:$0xff] %vm1651_vm11, %v1610_v27 }
 0x31f   : > { %1813 = vst.msk [vmem:[%s2144_s11 + $0x1f0] sm:$0xff] %vm1779_vm12, %v1756_v1 }
 0x320   : > { %1814 = vst.msk [vmem:[%s2144_s11 + $0x1f8] sm:$0xff] %vm1781_vm5, %v1756_v1 }
 0x321   : > { %1795 = vst.msk [vmem:[%s2144_s11 + $0xf0] sm:$0xff] %vm1779_vm12, %v3226_v6 }
 0x324   : > { %v1628_v11 = vpop.permute.xlu2 %1627 }
 0x325   : > { %1685 = vst.msk [vmem:[%s2144_s11 + $0x208] sm:$0xff] %vm1649_vm14, %v1628_v11 }
 0x326   : > { %1686 = vst.msk [vmem:[%s2144_s11 + $0x210] sm:$0xff] %vm1651_vm11, %v1628_v11 }
 0x32c   : > { %v1758_v50 = vpop.permute.xlu2 %1757 }
 0x32d   : > { %1815 = vst.msk [vmem:[%s2144_s11 + $0x210] sm:$0xff] %vm1779_vm12, %v1758_v50 }
 0x32e   : > { %1816 = vst.msk [vmem:[%s2144_s11 + $0x218] sm:$0xff] %vm1781_vm5, %v1758_v50 }
 0x334   : > { %v1482_v31 = vpop.permute.xlu1 %1481 }
 0x335   : > { %1538 = vst.msk [vmem:[%s2144_s11 + $0x100] sm:$0x1] %vm1537_vm15, %v1482_v31 }
 0x336   : > { %1540 = vst.msk [vmem:[%s2144_s11 + $0x108] sm:$0x1] %vm1539_vm1, %v1482_v31 }
 0x33c   : > { %v1500_v15 = vpop.permute.xlu1 %1499 }
 0x33d   : > { %1557 = vst.msk [vmem:[%s2144_s11 + $0x220] sm:$0x1] %vm1537_vm15, %v1500_v15 }
 0x33e   : > { %1558 = vst.msk [vmem:[%s2144_s11 + $0x228] sm:$0x1] %vm1539_vm1, %v1500_v15 }
 0x344   : > { %v1612_v22 = vpop.permute.xlu1 %1611 }
 0x345   : > { %1668 = vst.msk [vmem:[%s2144_s11 + $0x108] sm:$0x1] %vm1667_vm3, %v1612_v22 }
 0x346   : > { %1670 = vst.msk [vmem:[%s2144_s11 + $0x110] sm:$0x1] %vm1669_vm4, %v1612_v22 }
 0x347   : > { %1798 = vst.msk [vmem:[%s2144_s11 + $0x110] sm:$0x1] %vm1797_vm8, %v3268_v26 }
 0x34c   : > { %v1630_v6 = vpop.permute.xlu1 %1629 }
 0x34d   : > { %1687 = vst.msk [vmem:[%s2144_s11 + $0x228] sm:$0x1] %vm1667_vm3, %v1630_v6 }
 0x34e   : > { %1688 = vst.msk [vmem:[%s2144_s11 + $0x230] sm:$0x1] %vm1669_vm4, %v1630_v6 }
 0x354   : > { %v1760_v38 = vpop.permute.xlu1 %1759 }
 0x355   : > { %1817 = vst.msk [vmem:[%s2144_s11 + $0x230] sm:$0x1] %vm1797_vm8, %v1760_v38 }
 0x356   : > { %1818 = vst.msk [vmem:[%s2144_s11 + $0x238] sm:$0x1] %vm1799_vm2, %v1760_v38 }
 0x357 PF: > { %s15_s18 = sadd.s32 1, %s2081_s18  }
 0x358   : > { %p12_p4 = scmp.ge.s32.totalorder %s15_s18, 6  }
 0x35a   :  { %14 = sbr.rel (!%p12_p4) target bundleno = 1 (0x1), region = 73 }

</bundles_post_ra>
